<compile_context>
chip_gen: v6e
topology: v6e:2x2x1
jax: 0.10.0
libtpu: 0.0.40
codegen_flags: <defaults>
</compile_context>

<pallas_src>
import jax
import jax.numpy as jnp
from jax.experimental import pallas as pl
from jax.experimental.pallas import tpu as pltpu

D_IN = 128
D_H1 = 256
D_H2 = 512
OUT_RAW = 784
OUT_PAD = 896  # 7 * 128, lane-dense output tiles (unmasked vst)

TB_MAX = 512


def _round_up(n, m):
    return ((n + m - 1) // m) * m


def _cdiv(a, b):
    return -(-a // b)


def _leaky_relu(x, slope=0.2):
    return jnp.where(x > 0, x, slope * x)


def _pick_tile(B):
    """Batch tile: <=512 rows, >=2 grid steps when B > 128 (v7x megacore),
    and sized to keep batch padding under one sublane group."""
    if B <= 128:
        return max(8, _round_up(B, 8))
    num_tiles = max(2, _cdiv(B, TB_MAX))
    return _round_up(_cdiv(B, num_tiles), 8)


def generator_kernel(x_ref, w1_ref, b1_ref, w2_ref, b2_ref, w3_ref, b3_ref,
                     o_ref):
    # Layer 1: Linear(128 -> 256) + LeakyReLU(0.2).
    # bf16 into the MXU, f32 accumulate, f32 elementwise; the materialized
    # intermediate is stored bf16 (it feeds the next MXU op anyway).
    h1 = jnp.dot(x_ref[...].astype(jnp.bfloat16), w1_ref[...],
                 preferred_element_type=jnp.float32)
    h1 = _leaky_relu(h1 + b1_ref[...]).astype(jnp.bfloat16)

    # Layer 2: Linear(256 -> 512) + LeakyReLU(0.2)
    h2 = jnp.dot(h1, w2_ref[...], preferred_element_type=jnp.float32)
    h2 = _leaky_relu(h2 + b2_ref[...]).astype(jnp.bfloat16)

    # Layer 3: Linear(512 -> 896 padded) + Tanh.  Padded weight/bias columns
    # are exactly 0, so tanh(0)=0 in the padded lanes; store bf16.
    h3 = jnp.dot(h2, w3_ref[...], preferred_element_type=jnp.float32)
    o_ref[...] = jnp.tanh(h3 + b3_ref[...]).astype(o_ref.dtype)


def prepare_params(params):
    """One-time parameter prep (hoisted out of the per-call hot path):
    bf16 (in, out) weights, layer-3 zero-padded 784 -> 896, biases as
    (1, out) f32 rows for 2-D broadcast in the kernel."""
    w1 = params["w1"].astype(jnp.bfloat16)
    w2 = params["w2"].astype(jnp.bfloat16)
    w3 = jnp.pad(params["w3"],
                 ((0, 0), (0, OUT_PAD - OUT_RAW))).astype(jnp.bfloat16)
    b1 = params["b1"].astype(jnp.float32).reshape(1, -1)
    b2 = params["b2"].astype(jnp.float32).reshape(1, -1)
    b3 = jnp.pad(params["b3"].astype(jnp.float32),
                 ((0, OUT_PAD - OUT_RAW),)).reshape(1, -1)
    return {"w1": w1, "b1": b1, "w2": w2, "b2": b2, "w3": w3, "b3": b3}


def generator_forward(x, prepped, *, tb=None, unpad=True):
    """x: (B, 128) f32 or bf16 latent.  prepped: output of prepare_params().

    unpad=True  -> (B, 784) bf16 (module-equivalent contract; the slice is a
                   separate XLA copy).
    unpad=False -> (Bp, 896) bf16 padded buffer (hot path: lets the consumer
                   fuse/skip the slice and avoids an extra HBM pass)."""
    B, d_in = x.shape
    assert d_in == D_IN, x.shape

    if tb is None:
        tb = _pick_tile(B)
    Bp = _round_up(B, tb)
    if Bp != B:
        x = jnp.pad(x, ((0, Bp - B), (0, 0)))

    w1, b1 = prepped["w1"], prepped["b1"]
    w2, b2 = prepped["w2"], prepped["b2"]
    w3, b3 = prepped["w3"], prepped["b3"]

    grid = (Bp // tb,)

    # Constant-index specs: fetched once, VMEM-resident across grid steps.
    const = lambda arr: pl.BlockSpec(arr.shape, lambda i: (0, 0))

    flops = 2 * Bp * (D_IN * D_H1 + D_H1 * D_H2 + D_H2 * OUT_PAD)
    transcendentals = Bp * OUT_PAD  # tanh
    bytes_accessed = (Bp * D_IN * x.dtype.itemsize        # input
                      + Bp * OUT_PAD * 2                  # bf16 output
                      + (w1.size + w2.size + w3.size) * 2  # bf16 weights
                      + (b1.size + b2.size + b3.size) * 4)  # f32 biases

    out = pl.pallas_call(
        generator_kernel,
        out_shape=jax.ShapeDtypeStruct((Bp, OUT_PAD), jnp.bfloat16),
        grid=grid,
        in_specs=[
            pl.BlockSpec((tb, D_IN), lambda i: (i, 0)),
            const(w1), const(b1),
            const(w2), const(b2),
            const(w3), const(b3),
        ],
        out_specs=pl.BlockSpec((tb, OUT_PAD), lambda i: (i, 0)),
        compiler_params=pltpu.CompilerParams(
            dimension_semantics=("parallel",),
            vmem_limit_bytes=32 << 20,
        ),
        cost_estimate=pl.CostEstimate(
            flops=flops,
            transcendentals=transcendentals,
            bytes_accessed=bytes_accessed,
        ),
    )(x, w1, b1, w2, b2, w3, b3)

    if unpad:
        return out[:B, :OUT_RAW]
    return out


def init_params(key):
    """Deterministic synthetic parameters with the Generator's shapes."""
    ks = jax.random.split(key, 6)

    def linear_init(kw, kb, fan_in, fan_out):
        # PyTorch default: U(-1/sqrt(fan_in), 1/sqrt(fan_in))
        bound = 1.0 / jnp.sqrt(fan_in)
        w = jax.random.uniform(kw, (fan_in, fan_out), jnp.float32,
                               minval=-bound, maxval=bound)
        b = jax.random.uniform(kb, (fan_out,), jnp.float32,
                               minval=-bound, maxval=bound)
        return w, b

    w1, b1 = linear_init(ks[0], ks[1], D_IN, D_H1)
    w2, b2 = linear_init(ks[2], ks[3], D_H1, D_H2)
    w3, b3 = linear_init(ks[4], ks[5], D_H2, OUT_RAW)
    return {"w1": w1, "b1": b1, "w2": w2, "b2": b2, "w3": w3, "b3": b3}


def reference_forward(x, params):
    """Pure-JAX reference with the same bf16-at-the-MXU / f32-accumulate /
    f32-elementwise numerics as the kernel (output kept in f32)."""
    def mm(a, w):
        return jnp.dot(a.astype(jnp.bfloat16), w.astype(jnp.bfloat16),
                       preferred_element_type=jnp.float32)
    h = mm(x, params["w1"]) + params["b1"]
    h = jnp.where(h > 0, h, 0.2 * h)
    h = mm(h, params["w2"]) + params["b2"]
    h = jnp.where(h > 0, h, 0.2 * h)
    h = mm(h, params["w3"]) + params["b3"]
    return jnp.tanh(h)


if __name__ == "__main__":
    key = jax.random.PRNGKey(0)
    k_param, k_x = jax.random.split(key)

    params = init_params(k_param)
    prepped = prepare_params(params)          # one-time, outside the hot path

    B = 8
    # Latent z produced in bf16 upstream (no extra wrapper-side cast needed).
    x = jax.random.normal(k_x, (B, D_IN), jnp.float32).astype(jnp.bfloat16)

    out = generator_forward(x, prepped)       # (B, 784) bf16
    out = jax.block_until_ready(out)

    ref = reference_forward(x, params)        # f32 reference
    assert out.shape == (B, OUT_RAW), out.shape
    assert out.dtype == jnp.bfloat16, out.dtype
    err = float(jnp.max(jnp.abs(out.astype(jnp.float32) - ref)))
    # bf16 output quantization of tanh in [-1,1] adds up to ~4e-3 abs error.
    assert jnp.allclose(out.astype(jnp.float32), ref, atol=1e-2, rtol=1e-2), err

    # Padded hot-path variant (no post-kernel slice pass).
    out_pad = jax.block_until_ready(generator_forward(x, prepped, unpad=False))
    assert out_pad.shape[1] == OUT_PAD, out_pad.shape
    assert jnp.allclose(out_pad[:B, :OUT_RAW].astype(jnp.float32), ref,
                        atol=1e-2, rtol=1e-2)

    print("KERNEL_OK")
</pallas_src>

<mosaic_0001>
module attributes {stable_mosaic.version = 11 : i64} {
  func.func @generator_kernel(%arg0: i32, %arg1: memref<8x128xbf16, #tpu.memory_space<vmem>>, %arg2: memref<128x256xbf16, #tpu.memory_space<vmem>>, %arg3: memref<1x256xf32, #tpu.memory_space<vmem>>, %arg4: memref<256x512xbf16, #tpu.memory_space<vmem>>, %arg5: memref<1x512xf32, #tpu.memory_space<vmem>>, %arg6: memref<512x896xbf16, #tpu.memory_space<vmem>>, %arg7: memref<1x896xf32, #tpu.memory_space<vmem>>, %arg8: memref<8x896xbf16, #tpu.memory_space<vmem>>) attributes {dimension_semantics = [#tpu.dimension_semantics<parallel>], iteration_bounds = array<i64: 1>, scalar_prefetch = 0 : i64, scratch_operands = 0 : i64, tpu.core_type = #tpu.core_type<tc>, window_params = [{transform_indices = @transform_0, window_bounds = array<i64: 8, 128>}, {pipeline_mode = #tpu.pipeline_mode<synchronous>, transform_indices = @transform_1, window_bounds = array<i64: 128, 256>}, {pipeline_mode = #tpu.pipeline_mode<synchronous>, transform_indices = @transform_2, window_bounds = array<i64: 1, 256>}, {pipeline_mode = #tpu.pipeline_mode<synchronous>, transform_indices = @transform_3, window_bounds = array<i64: 256, 512>}, {pipeline_mode = #tpu.pipeline_mode<synchronous>, transform_indices = @transform_4, window_bounds = array<i64: 1, 512>}, {pipeline_mode = #tpu.pipeline_mode<synchronous>, transform_indices = @transform_5, window_bounds = array<i64: 512, 896>}, {pipeline_mode = #tpu.pipeline_mode<synchronous>, transform_indices = @transform_6, window_bounds = array<i64: 1, 896>}, {transform_indices = @transform_7, window_bounds = array<i64: 8, 896>}]} {
    %c0 = arith.constant 0 : index
    %c0_0 = arith.constant 0 : index
    %0 = vector.load %arg1[%c0, %c0_0] : memref<8x128xbf16, #tpu.memory_space<vmem>>, vector<8x128xbf16>
    %c0_1 = arith.constant 0 : index
    %c0_2 = arith.constant 0 : index
    %1 = vector.load %arg2[%c0_1, %c0_2] : memref<128x256xbf16, #tpu.memory_space<vmem>>, vector<128x256xbf16>
    %cst = arith.constant dense<0.000000e+00> : vector<8x256xf32>
    %2 = tpu.matmul %0, %1, %cst {dimension_numbers = #tpu.dot_dimension_numbers<[1], [0], [0], [1], [0, 0, 1, 1], [], []>} : vector<8x128xbf16>, vector<128x256xbf16>, vector<8x256xf32> -> vector<8x256xf32>
    %c0_3 = arith.constant 0 : index
    %c0_4 = arith.constant 0 : index
    %3 = vector.load %arg3[%c0_3, %c0_4] : memref<1x256xf32, #tpu.memory_space<vmem>>, vector<1x256xf32>
    %4 = vector.broadcast %3 : vector<1x256xf32> to vector<8x256xf32>
    %5 = arith.addf %2, %4 : vector<8x256xf32>
    %cst_5 = arith.constant 0.000000e+00 : f32
    %6 = vector.broadcast %cst_5 : f32 to vector<8x256xf32>
    %7 = arith.cmpf ogt, %5, %6 : vector<8x256xf32>
    %cst_6 = arith.constant 2.000000e-01 : f32
    %8 = vector.broadcast %cst_6 : f32 to vector<8x256xf32>
    %9 = arith.mulf %8, %5 : vector<8x256xf32>
    %10 = arith.select %7, %5, %9 : vector<8x256xi1>, vector<8x256xf32>
    %11 = arith.truncf %10 : vector<8x256xf32> to vector<8x256xbf16>
    %c0_7 = arith.constant 0 : index
    %c0_8 = arith.constant 0 : index
    %12 = vector.load %arg4[%c0_7, %c0_8] : memref<256x512xbf16, #tpu.memory_space<vmem>>, vector<256x512xbf16>
    %cst_9 = arith.constant dense<0.000000e+00> : vector<8x512xf32>
    %13 = tpu.matmul %11, %12, %cst_9 {dimension_numbers = #tpu.dot_dimension_numbers<[1], [0], [0], [1], [0, 0, 1, 1], [], []>} : vector<8x256xbf16>, vector<256x512xbf16>, vector<8x512xf32> -> vector<8x512xf32>
    %c0_10 = arith.constant 0 : index
    %c0_11 = arith.constant 0 : index
    %14 = vector.load %arg5[%c0_10, %c0_11] : memref<1x512xf32, #tpu.memory_space<vmem>>, vector<1x512xf32>
    %15 = vector.broadcast %14 : vector<1x512xf32> to vector<8x512xf32>
    %16 = arith.addf %13, %15 : vector<8x512xf32>
    %cst_12 = arith.constant 0.000000e+00 : f32
    %17 = vector.broadcast %cst_12 : f32 to vector<8x512xf32>
    %18 = arith.cmpf ogt, %16, %17 : vector<8x512xf32>
    %cst_13 = arith.constant 2.000000e-01 : f32
    %19 = vector.broadcast %cst_13 : f32 to vector<8x512xf32>
    %20 = arith.mulf %19, %16 : vector<8x512xf32>
    %21 = arith.select %18, %16, %20 : vector<8x512xi1>, vector<8x512xf32>
    %22 = arith.truncf %21 : vector<8x512xf32> to vector<8x512xbf16>
    %c0_14 = arith.constant 0 : index
    %c0_15 = arith.constant 0 : index
    %23 = vector.load %arg6[%c0_14, %c0_15] : memref<512x896xbf16, #tpu.memory_space<vmem>>, vector<512x896xbf16>
    %cst_16 = arith.constant dense<0.000000e+00> : vector<8x896xf32>
    %24 = tpu.matmul %22, %23, %cst_16 {dimension_numbers = #tpu.dot_dimension_numbers<[1], [0], [0], [1], [0, 0, 1, 1], [], []>} : vector<8x512xbf16>, vector<512x896xbf16>, vector<8x896xf32> -> vector<8x896xf32>
    %c0_17 = arith.constant 0 : index
    %c0_18 = arith.constant 0 : index
    %25 = vector.load %arg7[%c0_17, %c0_18] : memref<1x896xf32, #tpu.memory_space<vmem>>, vector<1x896xf32>
    %26 = vector.broadcast %25 : vector<1x896xf32> to vector<8x896xf32>
    %27 = arith.addf %24, %26 : vector<8x896xf32>
    %28 = math.tanh %27 : vector<8x896xf32>
    %29 = arith.truncf %28 : vector<8x896xf32> to vector<8x896xbf16>
    %c0_19 = arith.constant 0 : index
    %c0_20 = arith.constant 0 : index
    %30 = vector.load %arg8[%c0_19, %c0_20] : memref<8x896xbf16, #tpu.memory_space<vmem>>, vector<8x896xbf16>
    tpu.vector_store %arg8[%c0_19, %c0_20], %29 {strides = array<i32>} : memref<8x896xbf16, #tpu.memory_space<vmem>>, vector<8x896xbf16>,
    return
  }
  func.func @transform_0(%arg0: i32) -> (i32, i32) {
    %c0_i32 = arith.constant 0 : i32
    %c0_i32_0 = arith.constant 0 : i32
    return %arg0, %c0_i32 : i32, i32
  }
  func.func @transform_1(%arg0: i32) -> (i32, i32) {
    %c0_i32 = arith.constant 0 : i32
    %c0_i32_0 = arith.constant 0 : i32
    %c0_i32_1 = arith.constant 0 : i32
    return %c0_i32, %c0_i32_0 : i32, i32
  }
  func.func @transform_2(%arg0: i32) -> (i32, i32) {
    %c0_i32 = arith.constant 0 : i32
    %c0_i32_0 = arith.constant 0 : i32
    %c0_i32_1 = arith.constant 0 : i32
    return %c0_i32, %c0_i32_0 : i32, i32
  }
  func.func @transform_3(%arg0: i32) -> (i32, i32) {
    %c0_i32 = arith.constant 0 : i32
    %c0_i32_0 = arith.constant 0 : i32
    %c0_i32_1 = arith.constant 0 : i32
    return %c0_i32, %c0_i32_0 : i32, i32
  }
  func.func @transform_4(%arg0: i32) -> (i32, i32) {
    %c0_i32 = arith.constant 0 : i32
    %c0_i32_0 = arith.constant 0 : i32
    %c0_i32_1 = arith.constant 0 : i32
    return %c0_i32, %c0_i32_0 : i32, i32
  }
  func.func @transform_5(%arg0: i32) -> (i32, i32) {
    %c0_i32 = arith.constant 0 : i32
    %c0_i32_0 = arith.constant 0 : i32
    %c0_i32_1 = arith.constant 0 : i32
    return %c0_i32, %c0_i32_0 : i32, i32
  }
  func.func @transform_6(%arg0: i32) -> (i32, i32) {
    %c0_i32 = arith.constant 0 : i32
    %c0_i32_0 = arith.constant 0 : i32
    %c0_i32_1 = arith.constant 0 : i32
    return %c0_i32, %c0_i32_0 : i32, i32
  }
  func.func @transform_7(%arg0: i32) -> (i32, i32) {
    %c0_i32 = arith.constant 0 : i32
    %c0_i32_0 = arith.constant 0 : i32
    return %arg0, %c0_i32 : i32, i32
  }
}

</mosaic_0001>

<bundles_post_ra>
// kernel: tpu_custom_call.1
= control target key start
LH: loop header
LB: loop body
LE: loop exit
PB: predicated region body
PF: predicated region fallthrough
CT: control target
= control target key end

     0   :  { %12 = vsyncpa [#allocation3], 0  ;;  %s3670_s0 = inlined_call_operand.hbm [shape: bf16[8,128], index: 0, kind: input, shape index: {}]   ;;  %s3671_s1 = inlined_call_operand.hbm [shape: bf16[128,256], index: 1, kind: input, shape index: {}]   ;;  %s3672_s2 = inlined_call_operand.vmem [shape: f32[1,256], index: 2, kind: input, shape index: {}]   ;;  %s3673_s3 = inlined_call_operand.hbm [shape: bf16[256,512], index: 3, kind: input, shape index: {}]   ;;  %s3674_s4 = inlined_call_operand.hbm [shape: f32[1,512], index: 4, kind: input, shape index: {}]   ;;  %s3675_s5 = inlined_call_operand.hbm [shape: bf16[512,896], index: 5, kind: input, shape index: {}]   ;;  %s3676_s6 = inlined_call_operand.vmem [shape: f32[1,896], index: 6, kind: input, shape index: {}]   ;;  %s3677_s7 = inlined_call_operand.hbm [shape: bf16[8,896], index: 7, kind: output, shape index: {}]  }
   0x1   :  { %13 = vsyncpa [#allocation6], 0 }
   0x2   :  { %14 = vsyncpa [#allocation9], 0 }
   0x3   :  { %15 = vsyncpa [#allocation4], 0  ;;  %s3533_s24 = smov [#allocation5]  }
   0x4   :  { %s31_s25 = sshll.u32 %s3533_s24, 4  ;;  %s32_s25 = int_to_ptr.vmem [resolvable:$true] %s31_s25 }
   0x5   :  { %s3413_s26 = scalar_lea.vmem %s32_s25, 2048  ;;  %p3418_p1 = scmp.lt.s32.totalorder %s32_s25, %s32_s25 }
   0x6   :  { %p3414_p0 = scmp.ne.s32.totalorder %s32_s25, %s3413_s26  ;;  %p3419_p2 = scmp.lt.s32.totalorder %s3413_s26, %s3413_s26 }
   0x8   :  { %p3420_p3 = por %p3419_p2, %p3418_p1 }
   0xa   :  { %p3421_p4 = pnand %p3420_p3, %p3414_p0 }
   0xc   :  { %3424 = shalt.err (!%p3421_p4)
}
   0xd   :  { %s3534_s27 = smov 128   ;;  %s3535_s28 = smov 8  }
   0xe   :  { %37 = dma.hbm_to_vmem [thread:$0]  %s3671_s1, 2048, %s32_s25, [#allocation6], %s3534_s27, %s3534_s27, %s3535_s28  }
   0xf   :  { %s3536_s8 = smov [#allocation8]   ;;  %s3537_s10 = smov [#allocation2]  }
  0x10   :  { %s58_s9 = sshll.u32 %s3536_s8, 4  ;;  %s22_s11 = sshll.u32 %s3537_s10, 4  ;;  %s59_s9 = int_to_ptr.vmem [resolvable:$true] %s58_s9  ;;  %s23_s11 = int_to_ptr.vmem [resolvable:$true] %s22_s11 }
  0x11   :  { %s3433_s12 = scalar_lea.vmem %s59_s9, 64  ;;  %p3438_p6 = scmp.lt.s32.totalorder %s59_s9, %s59_s9 }
  0x12   :  { %p3434_p5 = scmp.ne.s32.totalorder %s59_s9, %s3433_s12  ;;  %p3439_p7 = scmp.lt.s32.totalorder %s3433_s12, %s3433_s12 }
  0x14   :  { %p3440_p8 = por %p3439_p7, %p3438_p6 }
  0x16   :  { %p3441_p9 = pnand %p3440_p8, %p3434_p5 }
  0x18   :  { %3444 = shalt.err (!%p3441_p9)
}
  0x19   :  { %61 = dma.hbm_to_vmem [thread:$0]  %s3674_s4, 64, %s59_s9, [#allocation9]  }
  0x1a   :  { %s3453_s15 = scalar_lea.vmem %s23_s11, 64  ;;  %p3458_p11 = scmp.lt.s32.totalorder %s23_s11, %s23_s11 }
  0x1b   :  { %p3454_p10 = scmp.ne.s32.totalorder %s23_s11, %s3453_s15  ;;  %p3459_p12 = scmp.lt.s32.totalorder %s3453_s15, %s3453_s15 }
  0x1d   :  { %p3460_p13 = por %p3459_p12, %p3458_p11 }
  0x1f   :  { %p3461_p0 = pnand %p3460_p13, %p3454_p10 }
  0x21   :  { %3464 = shalt.err (!%p3461_p0)
}
  0x22   :  { %25 = dma.hbm_to_vmem [thread:$0]  %s3670_s0, 64, %s23_s11, [#allocation3]  }
  0x23   :  { %s3538_s17 = smov [#allocation7]  }
  0x24   :  { %s45_s18 = sshll.u32 %s3538_s17, 4  ;;  %s46_s18 = int_to_ptr.vmem [resolvable:$true] %s45_s18 }
  0x25   :  { %s3473_s19 = scalar_lea.vmem %s46_s18, 8192  ;;  %p3478_p2 = scmp.lt.s32.totalorder %s46_s18, %s46_s18 }
  0x26   :  { %p3474_p1 = scmp.ne.s32.totalorder %s46_s18, %s3473_s19  ;;  %p3479_p3 = scmp.lt.s32.totalorder %s3473_s19, %s3473_s19 }
  0x28   :  { %p3480_p4 = por %p3479_p3, %p3478_p2 }
  0x2a   :  { %p3481_p5 = pnand %p3480_p4, %p3474_p1 }
  0x2c   :  { %3484 = shalt.err (!%p3481_p5)
}
  0x2d   :  { %s3539_s4 = smov 256   ;;  %s3540_s20 = smov 16  }
  0x2e   :  { %51 = dma.hbm_to_vmem [thread:$0]  %s3673_s3, 8192, %s46_s18, [#allocation6], %s3539_s4, %s3539_s4, %s3540_s20  }
  0x2f   :  { %s3541_s23 = smov [#allocation10]  }
  0x30   :  { %s67_s24 = sshll.u32 %s3541_s23, 4  ;;  %s68_s24 = int_to_ptr.vmem [resolvable:$true] %s67_s24 }
  0x31   :  { %s3493_s0 = scalar_lea.vmem %s68_s24, 28672  ;;  %p3498_p7 = scmp.lt.s32.totalorder %s68_s24, %s68_s24 }
  0x32   :  { %p3494_p6 = scmp.ne.s32.totalorder %s68_s24, %s3493_s0  ;;  %p3499_p8 = scmp.lt.s32.totalorder %s3493_s0, %s3493_s0 }
  0x34   :  { %p3500_p9 = por %p3499_p8, %p3498_p7 }
  0x36   :  { %p3501_p10 = pnand %p3500_p9, %p3494_p6 }
  0x38   :  { %3504 = shalt.err (!%p3501_p10)
}
  0x39   :  { %s3542_s25 = smov 448   ;;  %s3543_s26 = smov 28  }
  0x3a   :  { %73 = dma.hbm_to_vmem [thread:$0]  %s3675_s5, 28672, %s68_s24, [#allocation9], %s3542_s25, %s3542_s25, %s3543_s26  }
  0x3b   :  { %3525 = dma.done.wait [#allocation3], 64  }
  0x3c   :  { %3526 = vsyncadd [#allocation3], 4294967232 }
  0x3d   :  { %3527 = dma.done.wait [#allocation6], 10240  }
  0x3e   :  { %3528 = vsyncadd [#allocation6], 4294957056 }
  0x3f   :  { %3529 = dma.done.wait [#allocation9], 28736  }
  0x40   :  { %3530 = vsyncadd [#allocation9], 4294938560  ;;  %v3544_v0 = vmov 0   ;;  %v2951_v1 = vld [vmem:[#allocation5 + $0x74] ss:$8 sps:$4 sm:$0xff]  }
  0x41   :  { %233 = vmatprep.mubr.bf16.mxu0 %v3544_v0  ;;  %v2953_v2 = vld [vmem:[#allocation5 + $0x70] ss:$8 sps:$4 sm:$0xff]   ;;  %201 = vmatprep.subr.bf16.mxu0 %v2951_v1  ;;  %v2954_v3 = vld [vmem:[#allocation5 + $0x64] ss:$8 sps:$4 sm:$0xff]   ;;  %v2956_v4 = vld [vmem:[#allocation5 + $0x60] ss:$8 sps:$4 sm:$0xff]  }
  0x42   :  { %202 = vmatpush1.bf16.msra.mxu0 %v2953_v2  ;;  %v2957_v5 = vld [vmem:[#allocation5 + $0x54] ss:$8 sps:$4 sm:$0xff]   ;;  %v2959_v6 = vld [vmem:[#allocation5 + $0x50] ss:$8 sps:$4 sm:$0xff]   ;;  %v2960_v7 = vld [vmem:[#allocation5 + $0x44] ss:$8 sps:$4 sm:$0xff]  }
  0x43   :  { %203 = vmatprep.subr.bf16.mxu0 %v2954_v3  ;;  %v2962_v8 = vld [vmem:[#allocation5 + $0x40] ss:$8 sps:$4 sm:$0xff]   ;;  %v2975_v9 = vld [vmem:[#allocation7 + $0xe4] ss:$16 sps:$4 sm:$0xff]   ;;  %v2965_v13 = vld [vmem:[#allocation5 + $0x30] ss:$8 sps:$4 sm:$0xff]  }
  0x44   :  { %v2963_v10 = vld [vmem:[#allocation5 + $0x34] ss:$8 sps:$4 sm:$0xff]   ;;  %656 = vmatprep.subr.bf16.mxu1 %v2975_v9  ;;  %v2980_v11 = vld [vmem:[#allocation7 + $0xe0] ss:$16 sps:$4 sm:$0xff]   ;;  %v2966_v14 = vld [vmem:[#allocation5 + $0x24] ss:$8 sps:$4 sm:$0xff]  }
  0x45   :  { %v2981_v12 = vld [vmem:[#allocation7 + $0xc4] ss:$16 sps:$4 sm:$0xff]   ;;  %657 = vmatpush1.bf16.msra.mxu1 %v2980_v11  ;;  %v2986_v15 = vld [vmem:[#allocation7 + $0xc0] ss:$16 sps:$4 sm:$0xff]   ;;  %v2979_v26 = vld [vmem:[#allocation7 + $0xec] ss:$16 sps:$4 sm:$0xff]  }
  0x46   :  { %204 = vmatpush1.bf16.msra.mxu0 %v2956_v4  ;;  %658 = vmatprep.subr.bf16.mxu1 %v2981_v12  ;;  %v2987_v16 = vld [vmem:[#allocation7 + $0xa4] ss:$16 sps:$4 sm:$0xff]   ;;  %v2968_v17 = vld [vmem:[#allocation5 + $0x20] ss:$8 sps:$4 sm:$0xff]   ;;  %v2971_v21 = vld [vmem:[#allocation5 + $0x10] ss:$8 sps:$4 sm:$0xff]  }
  0x47   :  { %205 = vmatprep.subr.bf16.mxu0 %v2957_v5  ;;  %v2969_v18 = vld [vmem:[#allocation5 + $0x14] ss:$8 sps:$4 sm:$0xff]   ;;  %v2992_v19 = vld [vmem:[#allocation7 + $0xa0] ss:$16 sps:$4 sm:$0xff]   ;;  %v2972_v22 = vld [vmem:[#allocation5 + $0x4] ss:$8 sps:$4 sm:$0xff]  }
  0x48   :  { %v2993_v20 = vld [vmem:[#allocation7 + $0x84] ss:$16 sps:$4 sm:$0xff]   ;;  %v2998_v23 = vld [vmem:[#allocation7 + $0x80] ss:$16 sps:$4 sm:$0xff]   ;;  %v92_v29 = vld [vmem:[#allocation2] sm:$0xf] }
  0x49   :  { %659 = vmatpush1.bf16.msra.mxu1 %v2986_v15  ;;  %v2999_v24 = vld [vmem:[#allocation7 + $0x64] ss:$16 sps:$4 sm:$0xff]   ;;  %v2974_v25 = vld [vmem:[#allocation5] ss:$8 sps:$4 sm:$0xff]   ;;  %v2985_v31 = vld [vmem:[#allocation7 + $0xcc] ss:$16 sps:$4 sm:$0xff]  }
  0x4a   :  { %206 = vmatpush1.bf16.msra.mxu0 %v2959_v6  ;;  %660 = vmatprep.subr.bf16.mxu1 %v2987_v16  ;;  %v3004_v27 = vld [vmem:[#allocation7 + $0x60] ss:$16 sps:$4 sm:$0xff]   ;;  %v3005_v28 = vld [vmem:[#allocation7 + $0x44] ss:$16 sps:$4 sm:$0xff]   ;;  %v2977_v30 = vld [vmem:[#allocation7 + $0xe8] ss:$16 sps:$4 sm:$0xff]  }
  0x4b   :  { %207 = vmatprep.subr.bf16.mxu0 %v2960_v7  ;;  %v3010_v32 = vld [vmem:[#allocation7 + $0x40] ss:$16 sps:$4 sm:$0xff]   ;;  %v3011_v33 = vld [vmem:[#allocation7 + $0x24] ss:$16 sps:$4 sm:$0xff]   ;;  %v2983_v34 = vld [vmem:[#allocation7 + $0xc8] ss:$16 sps:$4 sm:$0xff]  }
  0x4c   :  { %v2991_v35 = vld [vmem:[#allocation7 + $0xac] ss:$16 sps:$4 sm:$0xff]   ;;  %v3016_v36 = vld [vmem:[#allocation7 + $0x20] ss:$16 sps:$4 sm:$0xff]   ;;  %v3017_v37 = vld [vmem:[#allocation7 + $0x4] ss:$16 sps:$4 sm:$0xff]  }
  0x4d   :  { %661 = vmatpush1.bf16.msra.mxu1 %v2992_v19  ;;  %v2989_v38 = vld [vmem:[#allocation7 + $0xa8] ss:$16 sps:$4 sm:$0xff]   ;;  %v2997_v39 = vld [vmem:[#allocation7 + $0x8c] ss:$16 sps:$4 sm:$0xff]   ;;  %v3022_v40 = vld [vmem:[#allocation7] ss:$16 sps:$4 sm:$0xff]  }
  0x4e   :  { %208 = vmatpush1.bf16.msra.mxu0 %v2962_v8  ;;  %662 = vmatprep.subr.bf16.mxu1 %v2993_v20  ;;  %v3023_v41 = vld [vmem:[#allocation7 + $0x1e4] ss:$16 sps:$4 sm:$0xff]   ;;  %v2995_v42 = vld [vmem:[#allocation7 + $0x88] ss:$16 sps:$4 sm:$0xff]   ;;  %v3003_v43 = vld [vmem:[#allocation7 + $0x6c] ss:$16 sps:$4 sm:$0xff]   ;;  %v111_v20 = vlaneseq }
  0x4f   :  { %209 = vmatprep.subr.bf16.mxu0 %v2963_v10  ;;  %v3028_v44 = vld [vmem:[#allocation7 + $0x1e0] ss:$16 sps:$4 sm:$0xff]   ;;  %v3029_v45 = vld [vmem:[#allocation7 + $0x1c4] ss:$16 sps:$4 sm:$0xff]   ;;  %v3001_v46 = vld [vmem:[#allocation7 + $0x68] ss:$16 sps:$4 sm:$0xff]  }
  0x50   :  { %v3009_v47 = vld [vmem:[#allocation7 + $0x4c] ss:$16 sps:$4 sm:$0xff]   ;;  %v3034_v48 = vld [vmem:[#allocation7 + $0x1c0] ss:$16 sps:$4 sm:$0xff]   ;;  %v3035_v49 = vld [vmem:[#allocation7 + $0x1a4] ss:$16 sps:$4 sm:$0xff]  }
  0x51   :  { %663 = vmatpush1.bf16.msra.mxu1 %v2998_v23  ;;  %v3007_v50 = vld [vmem:[#allocation7 + $0x48] ss:$16 sps:$4 sm:$0xff]   ;;  %v3040_v51 = vld [vmem:[#allocation7 + $0x1a0] ss:$16 sps:$4 sm:$0xff]   ;;  %v3015_v52 = vld [vmem:[#allocation7 + $0x2c] ss:$16 sps:$4 sm:$0xff]  }
  0x52   :  { %210 = vmatpush1.bf16.msra.mxu0 %v2965_v13  ;;  %664 = vmatprep.subr.bf16.mxu1 %v2999_v24  ;;  %v3041_v53 = vld [vmem:[#allocation7 + $0x184] ss:$16 sps:$4 sm:$0xff]   ;;  %v3013_v54 = vld [vmem:[#allocation7 + $0x28] ss:$16 sps:$4 sm:$0xff]   ;;  %v3046_v55 = vld [vmem:[#allocation7 + $0x180] ss:$16 sps:$4 sm:$0xff]  }
  0x53   :  { %211 = vmatprep.subr.bf16.mxu0 %v2966_v14  ;;  %v3021_v56 = vld [vmem:[#allocation7 + $0xc] ss:$16 sps:$4 sm:$0xff]   ;;  %v3047_v57 = vld [vmem:[#allocation7 + $0x164] ss:$16 sps:$4 sm:$0xff]   ;;  %v3019_v58 = vld [vmem:[#allocation7 + $0x8] ss:$16 sps:$4 sm:$0xff]  }
  0x54   :  { %v3052_v59 = vld [vmem:[#allocation7 + $0x160] ss:$16 sps:$4 sm:$0xff]   ;;  %v3027_v60 = vld [vmem:[#allocation7 + $0x1ec] ss:$16 sps:$4 sm:$0xff]   ;;  %v3053_v61 = vld [vmem:[#allocation7 + $0x144] ss:$16 sps:$4 sm:$0xff]  }
  0x55   :  { %665 = vmatpush1.bf16.msra.mxu1 %v3004_v27  ;;  %v3025_v62 = vld [vmem:[#allocation7 + $0x1e8] ss:$16 sps:$4 sm:$0xff]   ;;  %v3033_v63 = vld [vmem:[#allocation7 + $0x1cc] ss:$16 sps:$4 sm:$0xff]   ;;  %v3058_v9 = vld [vmem:[#allocation7 + $0x140] ss:$16 sps:$4 sm:$0xff]  }
  0x56   :  { %212 = vmatpush1.bf16.msra.mxu0 %v2968_v17  ;;  %666 = vmatprep.subr.bf16.mxu1 %v3005_v28  ;;  %v3031_v0 = vld [vmem:[#allocation7 + $0x1c8] ss:$16 sps:$4 sm:$0xff]   ;;  %v3039_v1 = vld [vmem:[#allocation7 + $0x1ac] ss:$16 sps:$4 sm:$0xff]   ;;  %v3059_v10 = vld [vmem:[#allocation7 + $0x124] ss:$16 sps:$4 sm:$0xff]  }
  0x57   :  { %213 = vmatprep.subr.bf16.mxu0 %v2969_v18  ;;  %v3037_v2 = vld [vmem:[#allocation7 + $0x1a8] ss:$16 sps:$4 sm:$0xff]   ;;  %v3045_v3 = vld [vmem:[#allocation7 + $0x18c] ss:$16 sps:$4 sm:$0xff]   ;;  %v3064_v13 = vld [vmem:[#allocation7 + $0x120] ss:$16 sps:$4 sm:$0xff]  }
  0x58   :  { %v3043_v4 = vld [vmem:[#allocation7 + $0x188] ss:$16 sps:$4 sm:$0xff]   ;;  %v3051_v5 = vld [vmem:[#allocation7 + $0x16c] ss:$16 sps:$4 sm:$0xff]   ;;  %v3065_v14 = vld [vmem:[#allocation7 + $0x104] ss:$16 sps:$4 sm:$0xff]  }
  0x59   :  { %667 = vmatpush1.bf16.msra.mxu1 %v3010_v32  ;;  %v3049_v6 = vld [vmem:[#allocation7 + $0x168] ss:$16 sps:$4 sm:$0xff]   ;;  %v3057_v7 = vld [vmem:[#allocation7 + $0x14c] ss:$16 sps:$4 sm:$0xff]   ;;  %v3070_v17 = vld [vmem:[#allocation7 + $0x100] ss:$16 sps:$4 sm:$0xff]  }
  0x5a   :  { %214 = vmatpush1.bf16.msra.mxu0 %v2971_v21  ;;  %668 = vmatprep.subr.bf16.mxu1 %v3011_v33  ;;  %v3055_v8 = vld [vmem:[#allocation7 + $0x148] ss:$16 sps:$4 sm:$0xff]   ;;  %v3063_v11 = vld [vmem:[#allocation7 + $0x12c] ss:$16 sps:$4 sm:$0xff]   ;;  %v3601_v21 = vshrl.u32 %v111_v20, 7 }
  0x5b   :  { %215 = vmatprep.subr.bf16.mxu0 %v2972_v22  ;;  %v3061_v12 = vld [vmem:[#allocation7 + $0x128] ss:$16 sps:$4 sm:$0xff]   ;;  %v3069_v15 = vld [vmem:[#allocation7 + $0x10c] ss:$16 sps:$4 sm:$0xff]   ;;  %v109_v23 = vld [vmem:[%s3672_s2] sm:$0x3] }
  0x5c   :  { %v3067_v16 = vld [vmem:[#allocation7 + $0x108] ss:$16 sps:$4 sm:$0xff]   ;;  %v3073_v18 = vld [vmem:[#allocation10 + $0x18c] ss:$28 sps:$4 sm:$0xff]   ;;  %v3604_v22 = vsub.s32 0, %v3601_v21  ;;  %v3610_v24 = vsub.s32 1, %v3601_v21 }
  0x5d   :  { %669 = vmatpush1.bf16.msra.mxu1 %v3016_v36  ;;  %v3076_v19 = vld [vmem:[#allocation10 + $0x50c] ss:$28 sps:$4 sm:$0xff]   ;;  %v3140_v20 = vld [vmem:[#allocation10 + $0x620] ss:$28 sps:$4 sm:$0xff]  }
  0x5e   :  { %216 = vmatpush1.bf16.msra.mxu0 %v2974_v25  ;;  %670 = vmatprep.subr.bf16.mxu1 %v3017_v37  ;;  %v114_v25 = vrot.slane %v109_v23, %v3604_v22 }
  0x5f   :  { %697 = vmatprep.subr.bf16.mxu0 %v2979_v26  ;;  %v118_v26 = vrot.slane %v109_v23, %v3610_v24  ;;  %v3145_v23 = vld [vmem:[#allocation10 + $0x26c] ss:$28 sps:$4 sm:$0xff]  }
  0x61   :  { %234 = vmatmul.mubr.bf16.vlgmr.msra.gmra.mxu0 %v92_v29  ;;  %671 = vmatpush1.bf16.msra.mxu1 %v3022_v40 }
  0x62   :  { %698 = vmatpush1.bf16.msra.mxu0 %v2977_v30  ;;  %672 = vmatprep.subr.bf16.mxu1 %v3023_v41  ;;  %v3079_v41 = vld [vmem:[#allocation10 + $0x154] ss:$28 sps:$4 sm:$0xff]  }
  0x63   :  { %699 = vmatprep.subr.bf16.mxu0 %v2985_v31 }
  0x65   :  { %673 = vmatpush2.bf16.msra.mxu1 %v3028_v44  ;;  %v3080_v44 = vld [vmem:[#allocation10 + $0x4d0] ss:$28 sps:$4 sm:$0xff]  }
  0x66   :  { %700 = vmatpush1.bf16.msra.mxu0 %v2983_v34  ;;  %674 = vmatprep.subr.bf16.mxu1 %v3029_v45  ;;  %v3085_v45 = vld [vmem:[#allocation10 + $0x11c] ss:$28 sps:$4 sm:$0xff]  }
  0x67   :  { %701 = vmatprep.subr.bf16.mxu0 %v2991_v35 }
  0x69   :  { %675 = vmatpush2.bf16.msra.mxu1 %v3034_v48  ;;  %v3086_v48 = vld [vmem:[#allocation10 + $0x498] ss:$28 sps:$4 sm:$0xff]  }
  0x6a   :  { %702 = vmatpush1.bf16.msra.mxu0 %v2989_v38  ;;  %676 = vmatprep.subr.bf16.mxu1 %v3035_v49  ;;  %v3071_v38 = vld [vmem:[#allocation10 + $0x188] ss:$28 sps:$4 sm:$0xff]  }
  0x6b   :  { %703 = vmatprep.subr.bf16.mxu0 %v2997_v39  ;;  %v3074_v39 = vld [vmem:[#allocation10 + $0x508] ss:$28 sps:$4 sm:$0xff]  }
  0x6c   :  { %v3091_v49 = vld [vmem:[#allocation10 + $0xe4] ss:$28 sps:$4 sm:$0xff]  }
  0x6d   :  { %677 = vmatpush2.bf16.msra.mxu1 %v3040_v51  ;;  %v3089_v51 = vld [vmem:[#allocation10 + $0xe0] ss:$28 sps:$4 sm:$0xff]  }
  0x6e   :  { %704 = vmatpush1.bf16.msra.mxu0 %v2995_v42  ;;  %678 = vmatprep.subr.bf16.mxu1 %v3041_v53  ;;  %v3082_v42 = vld [vmem:[#allocation10 + $0x4d4] ss:$28 sps:$4 sm:$0xff]   ;;  %v3097_v53 = vld [vmem:[#allocation10 + $0xac] ss:$28 sps:$4 sm:$0xff]  }
  0x6f   :  { %705 = vmatprep.subr.bf16.mxu0 %v3003_v43  ;;  %v3077_v43 = vld [vmem:[#allocation10 + $0x150] ss:$28 sps:$4 sm:$0xff]  }
  0x71   :  { %679 = vmatpush2.bf16.msra.mxu1 %v3046_v55  ;;  %v3095_v55 = vld [vmem:[#allocation10 + $0xa8] ss:$28 sps:$4 sm:$0xff]  }
  0x72   :  { %706 = vmatpush1.bf16.msra.mxu0 %v3001_v46  ;;  %680 = vmatprep.subr.bf16.mxu1 %v3047_v57  ;;  %v3088_v46 = vld [vmem:[#allocation10 + $0x49c] ss:$28 sps:$4 sm:$0xff]   ;;  %v3103_v57 = vld [vmem:[#allocation10 + $0x74] ss:$28 sps:$4 sm:$0xff]  }
  0x73   :  { %707 = vmatprep.subr.bf16.mxu0 %v3009_v47  ;;  %v3083_v47 = vld [vmem:[#allocation10 + $0x118] ss:$28 sps:$4 sm:$0xff]  }
  0x75   :  { %681 = vmatpush2.bf16.msra.mxu1 %v3052_v59  ;;  %v3101_v59 = vld [vmem:[#allocation10 + $0x70] ss:$28 sps:$4 sm:$0xff]  }
  0x76   :  { %708 = vmatpush1.bf16.msra.mxu0 %v3007_v50  ;;  %682 = vmatprep.subr.bf16.mxu1 %v3053_v61  ;;  %v3094_v50 = vld [vmem:[#allocation10 + $0x464] ss:$28 sps:$4 sm:$0xff]   ;;  %v3109_v61 = vld [vmem:[#allocation10 + $0x3c] ss:$28 sps:$4 sm:$0xff]  }
  0x77   :  { %709 = vmatprep.subr.bf16.mxu0 %v3015_v52  ;;  %v3092_v52 = vld [vmem:[#allocation10 + $0x460] ss:$28 sps:$4 sm:$0xff]  }
  0x79   :  { %683 = vmatpush2.bf16.msra.mxu1 %v3058_v9  ;;  %v3127_v9 = vld [vmem:[#allocation10 + $0x314] ss:$28 sps:$4 sm:$0xff]  }
  0x7a   :  { %710 = vmatpush1.bf16.msra.mxu0 %v3013_v54  ;;  %684 = vmatprep.subr.bf16.mxu1 %v3059_v10  ;;  %v3100_v54 = vld [vmem:[#allocation10 + $0x42c] ss:$28 sps:$4 sm:$0xff]   ;;  %v3130_v10 = vld [vmem:[#allocation10 + $0x694] ss:$28 sps:$4 sm:$0xff]  }
  0x7b   :  { %711 = vmatprep.subr.bf16.mxu0 %v3021_v56  ;;  %v3098_v56 = vld [vmem:[#allocation10 + $0x428] ss:$28 sps:$4 sm:$0xff]  }
  0x7d   :  { %685 = vmatpush2.bf16.msra.mxu1 %v3064_v13  ;;  %v3133_v13 = vld [vmem:[#allocation10 + $0x2dc] ss:$28 sps:$4 sm:$0xff]  }
  0x7e   :  { %712 = vmatpush1.bf16.msra.mxu0 %v3019_v58  ;;  %686 = vmatprep.subr.bf16.mxu1 %v3065_v14  ;;  %v3106_v58 = vld [vmem:[#allocation10 + $0x3f4] ss:$28 sps:$4 sm:$0xff]   ;;  %v3136_v14 = vld [vmem:[#allocation10 + $0x65c] ss:$28 sps:$4 sm:$0xff]  }
  0x7f   :  { %713 = vmatprep.subr.bf16.mxu0 %v3027_v60  ;;  %v3104_v60 = vld [vmem:[#allocation10 + $0x3f0] ss:$28 sps:$4 sm:$0xff]  }
  0x81   :  { %687 = vmatpush2.bf16.msra.mxu1 %v3070_v17  ;;  %v3139_v17 = vld [vmem:[#allocation10 + $0x2a4] ss:$28 sps:$4 sm:$0xff]  }
  0x82   :  { %714 = vmatpush2.bf16.msra.mxu0 %v3025_v62  ;;  %2199 = vmatprep.subr.bf16.mxu1 %v3073_v18  ;;  %v3112_v62 = vld [vmem:[#allocation10 + $0x3bc] ss:$28 sps:$4 sm:$0xff]   ;;  %v3142_v18 = vld [vmem:[#allocation10 + $0x624] ss:$28 sps:$4 sm:$0xff]  }
  0x83   :  { %715 = vmatprep.subr.bf16.mxu0 %v3033_v63  ;;  %v3107_v63 = vld [vmem:[#allocation10 + $0x38] ss:$28 sps:$4 sm:$0xff]  }
  0x86   :  { %716 = vmatpush2.bf16.msra.mxu0 %v3031_v0  ;;  %v3110_v0 = vld [vmem:[#allocation10 + $0x3b8] ss:$28 sps:$4 sm:$0xff]  }
  0x87   :  { %717 = vmatprep.subr.bf16.mxu0 %v3039_v1  ;;  %v3115_v1 = vld [vmem:[#allocation10 + $0x4] ss:$28 sps:$4 sm:$0xff]  }
  0x8a   :  { %718 = vmatpush2.bf16.msra.mxu0 %v3037_v2  ;;  %v3118_v2 = vld [vmem:[#allocation10 + $0x384] ss:$28 sps:$4 sm:$0xff]  }
  0x8b   :  { %719 = vmatprep.subr.bf16.mxu0 %v3045_v3  ;;  %v3113_v3 = vld [vmem:[#allocation10] ss:$28 sps:$4 sm:$0xff]  }
  0x8e   :  { %720 = vmatpush2.bf16.msra.mxu0 %v3043_v4  ;;  %v3116_v4 = vld [vmem:[#allocation10 + $0x380] ss:$28 sps:$4 sm:$0xff]  }
  0x8f   :  { %721 = vmatprep.subr.bf16.mxu0 %v3051_v5  ;;  %v3121_v5 = vld [vmem:[#allocation10 + $0x34c] ss:$28 sps:$4 sm:$0xff]  }
  0x92   :  { %722 = vmatpush2.bf16.msra.mxu0 %v3049_v6  ;;  %v3124_v6 = vld [vmem:[#allocation10 + $0x6cc] ss:$28 sps:$4 sm:$0xff]  }
  0x93   :  { %723 = vmatprep.subr.bf16.mxu0 %v3057_v7  ;;  %v3119_v7 = vld [vmem:[#allocation10 + $0x348] ss:$28 sps:$4 sm:$0xff]  }
  0x96   :  { %724 = vmatpush2.bf16.msra.mxu0 %v3055_v8  ;;  %v3122_v8 = vld [vmem:[#allocation10 + $0x6c8] ss:$28 sps:$4 sm:$0xff]  }
  0x97   :  { %725 = vmatprep.subr.bf16.mxu0 %v3063_v11  ;;  %v3125_v11 = vld [vmem:[#allocation10 + $0x310] ss:$28 sps:$4 sm:$0xff]  }
  0x9a   :  { %726 = vmatpush2.bf16.msra.mxu0 %v3061_v12  ;;  %v3128_v12 = vld [vmem:[#allocation10 + $0x690] ss:$28 sps:$4 sm:$0xff]  }
  0x9b   :  { %727 = vmatprep.subr.bf16.mxu0 %v3069_v15  ;;  %v3131_v15 = vld [vmem:[#allocation10 + $0x2d8] ss:$28 sps:$4 sm:$0xff]  }
  0x9e   :  { %728 = vmatpush2.bf16.msra.mxu0 %v3067_v16  ;;  %v3134_v16 = vld [vmem:[#allocation10 + $0x658] ss:$28 sps:$4 sm:$0xff]  }
  0x9f   :  { %2240 = vmatprep.subr.bf16.mxu0 %v3076_v19  ;;  %v3137_v19 = vld [vmem:[#allocation10 + $0x2a0] ss:$28 sps:$4 sm:$0xff]  }
 0x121   :  { %v235_v27 = vpop.f32.mrf.mxu0 }
 0x122   :  { %v236_v28 = vadd.f32 %v235_v27, %v114_v25  ;;  %v3148_v25 = vld [vmem:[#allocation10 + $0x5ec] ss:$28 sps:$4 sm:$0xff]  }
 0x123   :  { %v237_v29 = vpop.f32.mrf.mxu0  ;;  %v3146_v27 = vld [vmem:[#allocation10 + $0x5e8] ss:$28 sps:$4 sm:$0xff]  }
 0x124   :  { %vm242_vm0 = vcmp.gt.f32.partialorder %v236_v28, 0.0  ;;  %v244_v30 = vmul.f32 0.2, %v236_v28  ;;  %v238_v31 = vadd.f32 %v237_v29, %v118_v26  ;;  %v3143_v26 = vld [vmem:[#allocation10 + $0x268] ss:$28 sps:$4 sm:$0xff]  }
 0x125   :  { %v239_v32 = vpop.f32.mrf.mxu0  ;;  %v3154_v29 = vld [vmem:[#allocation10 + $0x5b4] ss:$28 sps:$4 sm:$0xff]  }
 0x126   :  { %v245_v33 = vmul.f32 0.2, %v238_v31  ;;  %vm243_vm1 = vcmp.gt.f32.partialorder %v238_v31, 0.0  ;;  %v246_v35 = vsel %vm242_vm0, %v236_v28, %v244_v30  ;;  %v3151_v28 = vld [vmem:[#allocation10 + $0x234] ss:$28 sps:$4 sm:$0xff]  }
 0x127   :  { %v240_v34 = vpop.f32.mrf.mxu0  ;;  %v248_v40 = vpack.c.bf16 %v246_v35, %v246_v35  ;;  %v3149_v30 = vld [vmem:[#allocation10 + $0x230] ss:$28 sps:$4 sm:$0xff]   ;;  %v3157_v32 = vld [vmem:[#allocation10 + $0x1fc] ss:$28 sps:$4 sm:$0xff]  }
 0x128   :  { %v247_v36 = vsel %vm243_vm1, %v238_v31, %v245_v33  ;;  %v3152_v31 = vld [vmem:[#allocation10 + $0x5b0] ss:$28 sps:$4 sm:$0xff]   ;;  %v3160_v33 = vld [vmem:[#allocation10 + $0x57c] ss:$28 sps:$4 sm:$0xff]  }
 0x129   :  { %v249_v37 = vpack.c.bf16 %v247_v36, %v247_v36  ;;  %v3155_v34 = vld [vmem:[#allocation10 + $0x1f8] ss:$28 sps:$4 sm:$0xff]   ;;  %v3163_v36 = vld [vmem:[#allocation10 + $0x1c4] ss:$28 sps:$4 sm:$0xff]  }
 0x12a   :  { %v3158_v35 = vld [vmem:[#allocation10 + $0x578] ss:$28 sps:$4 sm:$0xff]  }
 0x12b   :  { %688 = vmatprep.mubr.bf16.mxu1 %v249_v37  ;;  %729 = vmatprep.mubr.bf16.mxu0 %v249_v37  ;;  %v3166_v37 = vld [vmem:[#allocation10 + $0x544] ss:$28 sps:$4 sm:$0xff]  }
 0x12c   :  { %689 = vmatmul.mubr.bf16.vlgmr.msra.gmra.mxu1 %v248_v40  ;;  %730 = vmatmul.mubr.bf16.vlgmr.msra.gmra.mxu0 %v248_v40  ;;  %v3169_v40 = vld [vmem:[#allocation10 + $0x194] ss:$28 sps:$4 sm:$0xff]  }
 0x12d   :  { %2200 = vmatpush1.bf16.msra.mxu1 %v3071_v38  ;;  %2241 = vmatpush1.bf16.msra.mxu0 %v3074_v39  ;;  %v3161_v38 = vld [vmem:[#allocation10 + $0x1c0] ss:$28 sps:$4 sm:$0xff]  }
 0x12e   :  { %2201 = vmatprep.subr.bf16.mxu1 %v3079_v41  ;;  %2242 = vmatprep.subr.bf16.mxu0 %v3082_v42  ;;  %v3164_v39 = vld [vmem:[#allocation10 + $0x540] ss:$28 sps:$4 sm:$0xff]   ;;  %v3172_v41 = vld [vmem:[#allocation10 + $0x514] ss:$28 sps:$4 sm:$0xff]   ;;  %v326_v42 = vsub.s32 2, %v3601_v21 }
 0x131   :  { %2202 = vmatpush1.bf16.msra.mxu1 %v3077_v43  ;;  %2243 = vmatpush1.bf16.msra.mxu0 %v3080_v44  ;;  %v314_v43 = vld [vmem:[#allocation8] sm:$0xf]  ;;  %v330_v44 = vsub.s32 3, %v3601_v21 }
 0x132   :  { %2203 = vmatprep.subr.bf16.mxu1 %v3085_v45  ;;  %2244 = vmatprep.subr.bf16.mxu0 %v3088_v46  ;;  %v319_v45 = vrot.slane %v314_v43, %v3604_v22  ;;  %v327_v46 = vrot.slane %v314_v43, %v326_v42 }
 0x135   :  { %2204 = vmatpush1.bf16.msra.mxu1 %v3083_v47  ;;  %2245 = vmatpush1.bf16.msra.mxu0 %v3086_v48 }
 0x136   :  { %2205 = vmatprep.subr.bf16.mxu1 %v3091_v49  ;;  %2246 = vmatprep.subr.bf16.mxu0 %v3094_v50  ;;  %v323_v49 = vrot.slane %v314_v43, %v3610_v24  ;;  %v331_v50 = vrot.slane %v314_v43, %v330_v44  ;;  %v3217_v43 = vld [vmem:[#allocation10 + $0x354] ss:$28 sps:$4 sm:$0xff]  }
 0x139   :  { %2206 = vmatpush1.bf16.msra.mxu1 %v3089_v51  ;;  %2247 = vmatpush1.bf16.msra.mxu0 %v3092_v52 }
 0x13a   :  { %2207 = vmatprep.subr.bf16.mxu1 %v3097_v53  ;;  %2248 = vmatprep.subr.bf16.mxu0 %v3100_v54 }
 0x13d   :  { %2208 = vmatpush1.bf16.msra.mxu1 %v3095_v55  ;;  %2249 = vmatpush1.bf16.msra.mxu0 %v3098_v56 }
 0x13e   :  { %2209 = vmatprep.subr.bf16.mxu1 %v3103_v57  ;;  %2250 = vmatprep.subr.bf16.mxu0 %v3106_v58 }
 0x141   :  { %2210 = vmatpush1.bf16.msra.mxu1 %v3101_v59  ;;  %2251 = vmatpush1.bf16.msra.mxu0 %v3104_v60 }
 0x142   :  { %2211 = vmatprep.subr.bf16.mxu1 %v3109_v61  ;;  %2252 = vmatprep.subr.bf16.mxu0 %v3112_v62 }
 0x145   :  { %2212 = vmatpush1.bf16.msra.mxu1 %v3107_v63  ;;  %2253 = vmatpush1.bf16.msra.mxu0 %v3110_v0 }
 0x146   :  { %2213 = vmatprep.subr.bf16.mxu1 %v3115_v1  ;;  %2254 = vmatprep.subr.bf16.mxu0 %v3118_v2 }
 0x149   :  { %2214 = vmatpush1.bf16.msra.mxu1 %v3113_v3  ;;  %2255 = vmatpush1.bf16.msra.mxu0 %v3116_v4 }
 0x14a   :  { %2215 = vmatprep.subr.bf16.mxu1 %v3121_v5  ;;  %2256 = vmatprep.subr.bf16.mxu0 %v3124_v6  ;;  %v3167_v6 = vld [vmem:[#allocation10 + $0x190] ss:$28 sps:$4 sm:$0xff]  }
 0x14d   :  { %2216 = vmatpush2.bf16.msra.mxu1 %v3119_v7  ;;  %2257 = vmatpush2.bf16.msra.mxu0 %v3122_v8 }
 0x14e   :  { %2217 = vmatprep.subr.bf16.mxu1 %v3127_v9  ;;  %2258 = vmatprep.subr.bf16.mxu0 %v3130_v10  ;;  %v3170_v9 = vld [vmem:[#allocation10 + $0x510] ss:$28 sps:$4 sm:$0xff]  }
 0x151   :  { %2218 = vmatpush2.bf16.msra.mxu1 %v3125_v11  ;;  %2259 = vmatpush2.bf16.msra.mxu0 %v3128_v12  ;;  %v3175_v11 = vld [vmem:[#allocation10 + $0x15c] ss:$28 sps:$4 sm:$0xff]  }
 0x152   :  { %2219 = vmatprep.subr.bf16.mxu1 %v3133_v13  ;;  %2260 = vmatprep.subr.bf16.mxu0 %v3136_v14  ;;  %v3178_v12 = vld [vmem:[#allocation10 + $0x4dc] ss:$28 sps:$4 sm:$0xff]  }
 0x153   :  { %v3173_v13 = vld [vmem:[#allocation10 + $0x158] ss:$28 sps:$4 sm:$0xff]  }
 0x154   :  { %v3176_v14 = vld [vmem:[#allocation10 + $0x4d8] ss:$28 sps:$4 sm:$0xff]  }
 0x155   :  { %2220 = vmatpush2.bf16.msra.mxu1 %v3131_v15  ;;  %2261 = vmatpush2.bf16.msra.mxu0 %v3134_v16  ;;  %v3181_v15 = vld [vmem:[#allocation10 + $0x124] ss:$28 sps:$4 sm:$0xff]  }
 0x156   :  { %2221 = vmatprep.subr.bf16.mxu1 %v3139_v17  ;;  %2262 = vmatprep.subr.bf16.mxu0 %v3142_v18  ;;  %v3184_v16 = vld [vmem:[#allocation10 + $0x4a4] ss:$28 sps:$4 sm:$0xff]  }
 0x157   :  { %v3179_v17 = vld [vmem:[#allocation10 + $0x120] ss:$28 sps:$4 sm:$0xff]  }
 0x158   :  { %v3182_v18 = vld [vmem:[#allocation10 + $0x4a0] ss:$28 sps:$4 sm:$0xff]  }
 0x159   :  { %2222 = vmatpush2.bf16.msra.mxu1 %v3137_v19  ;;  %2263 = vmatpush2.bf16.msra.mxu0 %v3140_v20  ;;  %v3187_v19 = vld [vmem:[#allocation10 + $0xec] ss:$28 sps:$4 sm:$0xff]  }
 0x15a   :  { %2223 = vmatprep.subr.bf16.mxu1 %v3145_v23  ;;  %2264 = vmatprep.subr.bf16.mxu0 %v3148_v25  ;;  %v3190_v20 = vld [vmem:[#allocation10 + $0x46c] ss:$28 sps:$4 sm:$0xff]  }
 0x15b   :  { %v3185_v23 = vld [vmem:[#allocation10 + $0xe8] ss:$28 sps:$4 sm:$0xff]  }
 0x15c   :  { %v3188_v25 = vld [vmem:[#allocation10 + $0x468] ss:$28 sps:$4 sm:$0xff]  }
 0x15d   :  { %2224 = vmatpush2.bf16.msra.mxu1 %v3143_v26  ;;  %2265 = vmatpush2.bf16.msra.mxu0 %v3146_v27  ;;  %v3193_v26 = vld [vmem:[#allocation10 + $0xb4] ss:$28 sps:$4 sm:$0xff]  }
 0x15e   :  { %2225 = vmatprep.subr.bf16.mxu1 %v3151_v28  ;;  %2266 = vmatprep.subr.bf16.mxu0 %v3154_v29  ;;  %v3196_v27 = vld [vmem:[#allocation10 + $0x434] ss:$28 sps:$4 sm:$0xff]  }
 0x15f   :  { %v3191_v28 = vld [vmem:[#allocation10 + $0xb0] ss:$28 sps:$4 sm:$0xff]  }
 0x160   :  { %v3194_v29 = vld [vmem:[#allocation10 + $0x430] ss:$28 sps:$4 sm:$0xff]  }
 0x161   :  { %2226 = vmatpush2.bf16.msra.mxu1 %v3149_v30  ;;  %2267 = vmatpush2.bf16.msra.mxu0 %v3152_v31  ;;  %v3199_v30 = vld [vmem:[#allocation10 + $0x7c] ss:$28 sps:$4 sm:$0xff]  }
 0x162   :  { %2227 = vmatprep.subr.bf16.mxu1 %v3157_v32  ;;  %2268 = vmatprep.subr.bf16.mxu0 %v3160_v33  ;;  %v3202_v31 = vld [vmem:[#allocation10 + $0x3fc] ss:$28 sps:$4 sm:$0xff]  }
 0x163   :  { %v3197_v32 = vld [vmem:[#allocation10 + $0x78] ss:$28 sps:$4 sm:$0xff]  }
 0x164   :  { %v3200_v33 = vld [vmem:[#allocation10 + $0x3f8] ss:$28 sps:$4 sm:$0xff]  }
 0x165   :  { %2228 = vmatpush2.bf16.msra.mxu1 %v3155_v34  ;;  %2269 = vmatpush2.bf16.msra.mxu0 %v3158_v35  ;;  %v3205_v34 = vld [vmem:[#allocation10 + $0x44] ss:$28 sps:$4 sm:$0xff]  }
 0x166   :  { %2229 = vmatprep.subr.bf16.mxu1 %v3163_v36  ;;  %2270 = vmatprep.subr.bf16.mxu0 %v3166_v37  ;;  %v3208_v35 = vld [vmem:[#allocation10 + $0x3c4] ss:$28 sps:$4 sm:$0xff]  }
 0x167   :  { %v3203_v36 = vld [vmem:[#allocation10 + $0x40] ss:$28 sps:$4 sm:$0xff]  }
 0x168   :  { %v3206_v37 = vld [vmem:[#allocation10 + $0x3c0] ss:$28 sps:$4 sm:$0xff]  }
 0x169   :  { %2230 = vmatpush2.bf16.msra.mxu1 %v3161_v38  ;;  %2271 = vmatpush2.bf16.msra.mxu0 %v3164_v39  ;;  %v3211_v38 = vld [vmem:[#allocation10 + $0xc] ss:$28 sps:$4 sm:$0xff]  }
 0x16a   :  { %2281 = vmatprep.subr.bf16.mxu1 %v3169_v40  ;;  %2322 = vmatprep.subr.bf16.mxu0 %v3172_v41  ;;  %v3214_v39 = vld [vmem:[#allocation10 + $0x38c] ss:$28 sps:$4 sm:$0xff]  }
 0x16b   :  { %v3209_v40 = vld [vmem:[#allocation10 + $0x8] ss:$28 sps:$4 sm:$0xff]  }
 0x16c   :  { %v3212_v41 = vld [vmem:[#allocation10 + $0x388] ss:$28 sps:$4 sm:$0xff]  }
 0x1ec   :  { %v690_v47 = vpop.f32.mrf.mxu1  ;;  %v731_v48 = vpop.f32.mrf.mxu0 }
 0x1ed   :  { %v691_v51 = vadd.f32 %v690_v47, %v319_v45  ;;  %v732_v52 = vadd.f32 %v731_v48, %v327_v46  ;;  %v3220_v45 = vld [vmem:[#allocation10 + $0x6d4] ss:$28 sps:$4 sm:$0xff]   ;;  %v3223_v48 = vld [vmem:[#allocation10 + $0x31c] ss:$28 sps:$4 sm:$0xff]  }
 0x1ee   :  { %v692_v53 = vpop.f32.mrf.mxu1  ;;  %v733_v54 = vpop.f32.mrf.mxu0  ;;  %v3215_v46 = vld [vmem:[#allocation10 + $0x350] ss:$28 sps:$4 sm:$0xff]  }
 0x1ef   :  { %v742_v55 = vmul.f32 0.2, %v691_v51  ;;  %vm738_vm2 = vcmp.gt.f32.partialorder %v691_v51, 0.0  ;;  %v744_v56 = vmul.f32 0.2, %v732_v52  ;;  %v693_v57 = vadd.f32 %v692_v53, %v323_v49 }
 0x1f0   :  { %v734_v58 = vadd.f32 %v733_v54, %v331_v50  ;;  %v694_v59 = vpop.f32.mrf.mxu1  ;;  %v735_v60 = vpop.f32.mrf.mxu0  ;;  %vm740_vm3 = vcmp.gt.f32.partialorder %v732_v52, 0.0  ;;  %v3218_v47 = vld [vmem:[#allocation10 + $0x6d0] ss:$28 sps:$4 sm:$0xff]   ;;  %v3226_v49 = vld [vmem:[#allocation10 + $0x69c] ss:$28 sps:$4 sm:$0xff]  }
 0x1f1   :  { %vm739_vm4 = vcmp.gt.f32.partialorder %v693_v57, 0.0  ;;  %v743_v61 = vmul.f32 0.2, %v693_v57  ;;  %v746_v0 = vsel %vm738_vm2, %v691_v51, %v742_v55  ;;  %v748_v2 = vsel %vm740_vm3, %v732_v52, %v744_v56  ;;  %v3221_v50 = vld [vmem:[#allocation10 + $0x318] ss:$28 sps:$4 sm:$0xff]  }
 0x1f2   :  { %v695_v62 = vpop.f32.mrf.mxu1  ;;  %v736_v63 = vpop.f32.mrf.mxu0  ;;  %vm741_vm5 = vcmp.gt.f32.partialorder %v734_v58, 0.0  ;;  %v745_v1 = vmul.f32 0.2, %v734_v58  ;;  %v3624_v7 = vpack.c.bf16 %v746_v0, %v746_v0  ;;  %v3628_v10 = vpack.c.bf16 %v748_v2, %v748_v2  ;;  %v3224_v51 = vld [vmem:[#allocation10 + $0x698] ss:$28 sps:$4 sm:$0xff]  }
 0x1f3   :  { %v747_v3 = vsel %vm739_vm4, %v693_v57, %v743_v61  ;;  %v3229_v52 = vld [vmem:[#allocation10 + $0x2e4] ss:$28 sps:$4 sm:$0xff]   ;;  %v3235_v56 = vld [vmem:[#allocation10 + $0x2ac] ss:$28 sps:$4 sm:$0xff]   ;;  %v3241_v60 = vld [vmem:[#allocation10 + $0x274] ss:$28 sps:$4 sm:$0xff]  }
 0x1f4   :  { %v3622_v4 = vpack.c.bf16 %v747_v3, %v747_v3  ;;  %v749_v5 = vsel %vm741_vm5, %v734_v58, %v745_v1  ;;  %v3232_v53 = vld [vmem:[#allocation10 + $0x664] ss:$28 sps:$4 sm:$0xff]   ;;  %v3238_v57 = vld [vmem:[#allocation10 + $0x62c] ss:$28 sps:$4 sm:$0xff]   ;;  %v3244_v61 = vld [vmem:[#allocation10 + $0x5f4] ss:$28 sps:$4 sm:$0xff]  }
 0x1f5   :  { %v3626_v8 = vpack.c.bf16 %v749_v5, %v749_v5  ;;  %v3227_v54 = vld [vmem:[#allocation10 + $0x2e0] ss:$28 sps:$4 sm:$0xff]   ;;  %v3233_v58 = vld [vmem:[#allocation10 + $0x2a8] ss:$28 sps:$4 sm:$0xff]   ;;  %v3239_v62 = vld [vmem:[#allocation10 + $0x270] ss:$28 sps:$4 sm:$0xff]  }
 0x1f6   :  { %2231 = vmatprep.mubr.bf16.mxu1 %v3622_v4  ;;  %v3230_v55 = vld [vmem:[#allocation10 + $0x660] ss:$28 sps:$4 sm:$0xff]   ;;  %v3236_v59 = vld [vmem:[#allocation10 + $0x628] ss:$28 sps:$4 sm:$0xff]   ;;  %v3242_v63 = vld [vmem:[#allocation10 + $0x5f0] ss:$28 sps:$4 sm:$0xff]  }
 0x1f7   :  { %2272 = vmatprep.mubr.bf16.mxu0 %v3626_v8  ;;  %2232 = vmatmul.mubr.bf16.vlgmr.msra.gmra.mxu1 %v3624_v7  ;;  %v3247_v0 = vld [vmem:[#allocation10 + $0x23c] ss:$28 sps:$4 sm:$0xff]   ;;  %v3253_v5 = vld [vmem:[#allocation10 + $0x204] ss:$28 sps:$4 sm:$0xff]  }
 0x1f8   :  { %2273 = vmatmul.mubr.bf16.vlgmr.msra.gmra.mxu0 %v3628_v10  ;;  %2282 = vmatpush1.bf16.msra.mxu1 %v3167_v6  ;;  %v3250_v1 = vld [vmem:[#allocation10 + $0x5bc] ss:$28 sps:$4 sm:$0xff]   ;;  %v3256_v6 = vld [vmem:[#allocation10 + $0x584] ss:$28 sps:$4 sm:$0xff]  }
 0x1f9   :  { %2323 = vmatpush1.bf16.msra.mxu0 %v3170_v9  ;;  %2313 = vmatprep.mubr.bf16.mxu1 %v3622_v4  ;;  %v3245_v2 = vld [vmem:[#allocation10 + $0x238] ss:$28 sps:$4 sm:$0xff]   ;;  %v3251_v9 = vld [vmem:[#allocation10 + $0x200] ss:$28 sps:$4 sm:$0xff]  }
 0x1fa   :  { %2354 = vmatprep.mubr.bf16.mxu0 %v3626_v8  ;;  %2283 = vmatprep.subr.bf16.mxu1 %v3175_v11  ;;  %v3248_v3 = vld [vmem:[#allocation10 + $0x5b8] ss:$28 sps:$4 sm:$0xff]   ;;  %v3254_v11 = vld [vmem:[#allocation10 + $0x580] ss:$28 sps:$4 sm:$0xff]  }
 0x1fb   :  { %2324 = vmatprep.subr.bf16.mxu0 %v3178_v12  ;;  %v3259_v12 = vld [vmem:[#allocation10 + $0x1cc] ss:$28 sps:$4 sm:$0xff]  }
 0x1fc   :  { %2284 = vmatpush1.bf16.msra.mxu1 %v3173_v13  ;;  %v3262_v13 = vld [vmem:[#allocation10 + $0x54c] ss:$28 sps:$4 sm:$0xff]  }
 0x1fd   :  { %2325 = vmatpush1.bf16.msra.mxu0 %v3176_v14  ;;  %2285 = vmatprep.subr.bf16.mxu1 %v3181_v15  ;;  %v3257_v14 = vld [vmem:[#allocation10 + $0x1c8] ss:$28 sps:$4 sm:$0xff]  }
 0x1fe   :  { %2326 = vmatprep.subr.bf16.mxu0 %v3184_v16  ;;  %v3260_v15 = vld [vmem:[#allocation10 + $0x548] ss:$28 sps:$4 sm:$0xff]   ;;  %v3265_v16 = vld [vmem:[#allocation10 + $0x19c] ss:$28 sps:$4 sm:$0xff]  }
 0x200   :  { %2286 = vmatpush1.bf16.msra.mxu1 %v3179_v17  ;;  %v3268_v17 = vld [vmem:[#allocation10 + $0x51c] ss:$28 sps:$4 sm:$0xff]  }
 0x201   :  { %2327 = vmatpush1.bf16.msra.mxu0 %v3182_v18  ;;  %2287 = vmatprep.subr.bf16.mxu1 %v3187_v19  ;;  %v3263_v18 = vld [vmem:[#allocation10 + $0x198] ss:$28 sps:$4 sm:$0xff]  }
 0x202   :  { %2328 = vmatprep.subr.bf16.mxu0 %v3190_v20  ;;  %v3266_v19 = vld [vmem:[#allocation10 + $0x518] ss:$28 sps:$4 sm:$0xff]   ;;  %v3271_v20 = vld [vmem:[#allocation10 + $0x164] ss:$28 sps:$4 sm:$0xff]  }
 0x204   :  { %2288 = vmatpush1.bf16.msra.mxu1 %v3185_v23  ;;  %v3274_v23 = vld [vmem:[#allocation10 + $0x4e4] ss:$28 sps:$4 sm:$0xff]  }
 0x205   :  { %2329 = vmatpush1.bf16.msra.mxu0 %v3188_v25  ;;  %2289 = vmatprep.subr.bf16.mxu1 %v3193_v26  ;;  %v3269_v25 = vld [vmem:[#allocation10 + $0x160] ss:$28 sps:$4 sm:$0xff]  }
 0x206   :  { %2330 = vmatprep.subr.bf16.mxu0 %v3196_v27  ;;  %v3272_v26 = vld [vmem:[#allocation10 + $0x4e0] ss:$28 sps:$4 sm:$0xff]   ;;  %v3277_v27 = vld [vmem:[#allocation10 + $0x12c] ss:$28 sps:$4 sm:$0xff]  }
 0x208   :  { %2290 = vmatpush1.bf16.msra.mxu1 %v3191_v28  ;;  %v3280_v28 = vld [vmem:[#allocation10 + $0x4ac] ss:$28 sps:$4 sm:$0xff]  }
 0x209   :  { %2331 = vmatpush1.bf16.msra.mxu0 %v3194_v29  ;;  %2291 = vmatprep.subr.bf16.mxu1 %v3199_v30  ;;  %v3275_v29 = vld [vmem:[#allocation10 + $0x128] ss:$28 sps:$4 sm:$0xff]  }
 0x20a   :  { %2332 = vmatprep.subr.bf16.mxu0 %v3202_v31  ;;  %v3278_v30 = vld [vmem:[#allocation10 + $0x4a8] ss:$28 sps:$4 sm:$0xff]   ;;  %v3283_v31 = vld [vmem:[#allocation10 + $0xf4] ss:$28 sps:$4 sm:$0xff]  }
 0x20c   :  { %2292 = vmatpush1.bf16.msra.mxu1 %v3197_v32  ;;  %v3286_v32 = vld [vmem:[#allocation10 + $0x474] ss:$28 sps:$4 sm:$0xff]  }
 0x20d   :  { %2333 = vmatpush1.bf16.msra.mxu0 %v3200_v33  ;;  %2293 = vmatprep.subr.bf16.mxu1 %v3205_v34  ;;  %v3281_v33 = vld [vmem:[#allocation10 + $0xf0] ss:$28 sps:$4 sm:$0xff]  }
 0x20e   :  { %2334 = vmatprep.subr.bf16.mxu0 %v3208_v35  ;;  %v3284_v34 = vld [vmem:[#allocation10 + $0x470] ss:$28 sps:$4 sm:$0xff]   ;;  %v3289_v35 = vld [vmem:[#allocation10 + $0xbc] ss:$28 sps:$4 sm:$0xff]  }
 0x210   :  { %2294 = vmatpush1.bf16.msra.mxu1 %v3203_v36  ;;  %v3292_v36 = vld [vmem:[#allocation10 + $0x43c] ss:$28 sps:$4 sm:$0xff]  }
 0x211   :  { %2335 = vmatpush1.bf16.msra.mxu0 %v3206_v37  ;;  %2295 = vmatprep.subr.bf16.mxu1 %v3211_v38  ;;  %v3287_v37 = vld [vmem:[#allocation10 + $0xb8] ss:$28 sps:$4 sm:$0xff]  }
 0x212   :  { %2336 = vmatprep.subr.bf16.mxu0 %v3214_v39  ;;  %v3290_v38 = vld [vmem:[#allocation10 + $0x438] ss:$28 sps:$4 sm:$0xff]   ;;  %v3295_v39 = vld [vmem:[#allocation10 + $0x84] ss:$28 sps:$4 sm:$0xff]  }
 0x214   :  { %2296 = vmatpush1.bf16.msra.mxu1 %v3209_v40  ;;  %v3298_v40 = vld [vmem:[#allocation10 + $0x404] ss:$28 sps:$4 sm:$0xff]  }
 0x215   :  { %2337 = vmatpush1.bf16.msra.mxu0 %v3212_v41  ;;  %2297 = vmatprep.subr.bf16.mxu1 %v3217_v43  ;;  %v3293_v41 = vld [vmem:[#allocation10 + $0x80] ss:$28 sps:$4 sm:$0xff]  }
 0x216   :  { %2338 = vmatprep.subr.bf16.mxu0 %v3220_v45  ;;  %v3296_v43 = vld [vmem:[#allocation10 + $0x400] ss:$28 sps:$4 sm:$0xff]   ;;  %v3301_v45 = vld [vmem:[#allocation10 + $0x4c] ss:$28 sps:$4 sm:$0xff]  }
 0x218   :  { %2298 = vmatpush2.bf16.msra.mxu1 %v3215_v46  ;;  %v3304_v46 = vld [vmem:[#allocation10 + $0x3cc] ss:$28 sps:$4 sm:$0xff]  }
 0x219   :  { %2339 = vmatpush2.bf16.msra.mxu0 %v3218_v47  ;;  %2299 = vmatprep.subr.bf16.mxu1 %v3223_v48  ;;  %v3299_v47 = vld [vmem:[#allocation10 + $0x48] ss:$28 sps:$4 sm:$0xff]  }
 0x21a   :  { %2340 = vmatprep.subr.bf16.mxu0 %v3226_v49  ;;  %v3302_v48 = vld [vmem:[#allocation10 + $0x3c8] ss:$28 sps:$4 sm:$0xff]   ;;  %v3307_v49 = vld [vmem:[#allocation10 + $0x14] ss:$28 sps:$4 sm:$0xff]  }
 0x21c   :  { %2300 = vmatpush2.bf16.msra.mxu1 %v3221_v50  ;;  %v3310_v50 = vld [vmem:[#allocation10 + $0x394] ss:$28 sps:$4 sm:$0xff]  }
 0x21d   :  { %2341 = vmatpush2.bf16.msra.mxu0 %v3224_v51  ;;  %2301 = vmatprep.subr.bf16.mxu1 %v3229_v52  ;;  %v3305_v51 = vld [vmem:[#allocation10 + $0x10] ss:$28 sps:$4 sm:$0xff]  }
 0x21e   :  { %2342 = vmatprep.subr.bf16.mxu0 %v3232_v53  ;;  %v3308_v52 = vld [vmem:[#allocation10 + $0x390] ss:$28 sps:$4 sm:$0xff]   ;;  %v3313_v53 = vld [vmem:[#allocation10 + $0x35c] ss:$28 sps:$4 sm:$0xff]  }
 0x220   :  { %2302 = vmatpush2.bf16.msra.mxu1 %v3227_v54  ;;  %v3316_v54 = vld [vmem:[#allocation10 + $0x6dc] ss:$28 sps:$4 sm:$0xff]  }
 0x221   :  { %2343 = vmatpush2.bf16.msra.mxu0 %v3230_v55  ;;  %2303 = vmatprep.subr.bf16.mxu1 %v3235_v56  ;;  %v3311_v55 = vld [vmem:[#allocation10 + $0x358] ss:$28 sps:$4 sm:$0xff]  }
 0x222   :  { %2344 = vmatprep.subr.bf16.mxu0 %v3238_v57  ;;  %v3314_v56 = vld [vmem:[#allocation10 + $0x6d8] ss:$28 sps:$4 sm:$0xff]   ;;  %v3319_v57 = vld [vmem:[#allocation10 + $0x324] ss:$28 sps:$4 sm:$0xff]  }
 0x224   :  { %2304 = vmatpush2.bf16.msra.mxu1 %v3233_v58  ;;  %v3322_v58 = vld [vmem:[#allocation10 + $0x6a4] ss:$28 sps:$4 sm:$0xff]  }
 0x225   :  { %2345 = vmatpush2.bf16.msra.mxu0 %v3236_v59  ;;  %2305 = vmatprep.subr.bf16.mxu1 %v3241_v60  ;;  %v3317_v59 = vld [vmem:[#allocation10 + $0x320] ss:$28 sps:$4 sm:$0xff]  }
 0x226   :  { %2346 = vmatprep.subr.bf16.mxu0 %v3244_v61  ;;  %v3320_v60 = vld [vmem:[#allocation10 + $0x6a0] ss:$28 sps:$4 sm:$0xff]   ;;  %v3325_v61 = vld [vmem:[#allocation10 + $0x2ec] ss:$28 sps:$4 sm:$0xff]  }
 0x228   :  { %2306 = vmatpush2.bf16.msra.mxu1 %v3239_v62  ;;  %v3328_v62 = vld [vmem:[#allocation10 + $0x66c] ss:$28 sps:$4 sm:$0xff]  }
 0x229   :  { %2347 = vmatpush2.bf16.msra.mxu0 %v3242_v63  ;;  %2307 = vmatprep.subr.bf16.mxu1 %v3247_v0  ;;  %v3323_v63 = vld [vmem:[#allocation10 + $0x2e8] ss:$28 sps:$4 sm:$0xff]  }
 0x22a   :  { %2348 = vmatprep.subr.bf16.mxu0 %v3250_v1  ;;  %v3326_v0 = vld [vmem:[#allocation10 + $0x668] ss:$28 sps:$4 sm:$0xff]   ;;  %v3331_v1 = vld [vmem:[#allocation10 + $0x2b4] ss:$28 sps:$4 sm:$0xff]  }
 0x22c   :  { %2308 = vmatpush2.bf16.msra.mxu1 %v3245_v2  ;;  %v3334_v2 = vld [vmem:[#allocation10 + $0x634] ss:$28 sps:$4 sm:$0xff]  }
 0x22d   :  { %2349 = vmatpush2.bf16.msra.mxu0 %v3248_v3  ;;  %2309 = vmatprep.subr.bf16.mxu1 %v3253_v5  ;;  %v3329_v3 = vld [vmem:[#allocation10 + $0x2b0] ss:$28 sps:$4 sm:$0xff]  }
 0x22e   :  { %2350 = vmatprep.subr.bf16.mxu0 %v3256_v6  ;;  %v3332_v5 = vld [vmem:[#allocation10 + $0x630] ss:$28 sps:$4 sm:$0xff]   ;;  %v3337_v6 = vld [vmem:[#allocation10 + $0x27c] ss:$28 sps:$4 sm:$0xff]  }
 0x230   :  { %2310 = vmatpush2.bf16.msra.mxu1 %v3251_v9  ;;  %v3340_v9 = vld [vmem:[#allocation10 + $0x5fc] ss:$28 sps:$4 sm:$0xff]  }
 0x231   :  { %2351 = vmatpush2.bf16.msra.mxu0 %v3254_v11  ;;  %2311 = vmatprep.subr.bf16.mxu1 %v3259_v12  ;;  %v3335_v11 = vld [vmem:[#allocation10 + $0x278] ss:$28 sps:$4 sm:$0xff]  }
 0x232   :  { %2352 = vmatprep.subr.bf16.mxu0 %v3262_v13  ;;  %v3338_v12 = vld [vmem:[#allocation10 + $0x5f8] ss:$28 sps:$4 sm:$0xff]   ;;  %v3343_v13 = vld [vmem:[#allocation10 + $0x244] ss:$28 sps:$4 sm:$0xff]  }
 0x234   :  { %2312 = vmatpush2.bf16.msra.mxu1 %v3257_v14  ;;  %v3346_v14 = vld [vmem:[#allocation10 + $0x5c4] ss:$28 sps:$4 sm:$0xff]  }
 0x235   :  { %2353 = vmatpush2.bf16.msra.mxu0 %v3260_v15  ;;  %2363 = vmatprep.subr.bf16.mxu1 %v3265_v16  ;;  %v3341_v15 = vld [vmem:[#allocation10 + $0x240] ss:$28 sps:$4 sm:$0xff]  }
 0x236   :  { %2404 = vmatprep.subr.bf16.mxu0 %v3268_v17  ;;  %v3344_v16 = vld [vmem:[#allocation10 + $0x5c0] ss:$28 sps:$4 sm:$0xff]   ;;  %v3349_v17 = vld [vmem:[#allocation10 + $0x20c] ss:$28 sps:$4 sm:$0xff]  }
 0x237   :  { %2314 = vmatmul.mubr.bf16.vlgmr.msra.gmra.mxu1 %v3624_v7 }
 0x238   :  { %2355 = vmatmul.mubr.bf16.vlgmr.msra.gmra.mxu0 %v3628_v10  ;;  %2364 = vmatpush1.bf16.msra.mxu1 %v3263_v18  ;;  %v3352_v18 = vld [vmem:[#allocation10 + $0x58c] ss:$28 sps:$4 sm:$0xff]  }
 0x239   :  { %2395 = vmatprep.mubr.bf16.mxu1 %v3622_v4  ;;  %2405 = vmatpush1.bf16.msra.mxu0 %v3266_v19  ;;  %v3347_v19 = vld [vmem:[#allocation10 + $0x208] ss:$28 sps:$4 sm:$0xff]  }
 0x23a   :  { %2436 = vmatprep.mubr.bf16.mxu0 %v3626_v8  ;;  %2365 = vmatprep.subr.bf16.mxu1 %v3271_v20  ;;  %v3350_v20 = vld [vmem:[#allocation10 + $0x588] ss:$28 sps:$4 sm:$0xff]  }
 0x23b   :  { %2406 = vmatprep.subr.bf16.mxu0 %v3274_v23  ;;  %v3355_v23 = vld [vmem:[#allocation10 + $0x1d4] ss:$28 sps:$4 sm:$0xff]  }
 0x23c   :  { %2366 = vmatpush1.bf16.msra.mxu1 %v3269_v25  ;;  %v3358_v25 = vld [vmem:[#allocation10 + $0x554] ss:$28 sps:$4 sm:$0xff]  }
 0x23d   :  { %2407 = vmatpush1.bf16.msra.mxu0 %v3272_v26  ;;  %2367 = vmatprep.subr.bf16.mxu1 %v3277_v27  ;;  %v3353_v26 = vld [vmem:[#allocation10 + $0x1d0] ss:$28 sps:$4 sm:$0xff]  }
 0x23e   :  { %2408 = vmatprep.subr.bf16.mxu0 %v3280_v28  ;;  %v3356_v27 = vld [vmem:[#allocation10 + $0x550] ss:$28 sps:$4 sm:$0xff]   ;;  %v3359_v28 = vld [vmem:[#allocation10 + $0x360] ss:$28 sps:$4 sm:$0xff]  }
 0x240   :  { %2368 = vmatpush1.bf16.msra.mxu1 %v3275_v29  ;;  %v3360_v29 = vld [vmem:[#allocation10 + $0x6e0] ss:$28 sps:$4 sm:$0xff]  }
 0x241   :  { %2409 = vmatpush1.bf16.msra.mxu0 %v3278_v30  ;;  %2369 = vmatprep.subr.bf16.mxu1 %v3283_v31  ;;  %v3361_v30 = vld [vmem:[#allocation10 + $0x1a0] ss:$28 sps:$4 sm:$0xff]  }
 0x242   :  { %2410 = vmatprep.subr.bf16.mxu0 %v3286_v32  ;;  %v3362_v31 = vld [vmem:[#allocation10 + $0x520] ss:$28 sps:$4 sm:$0xff]   ;;  %v3363_v32 = vld [vmem:[#allocation10 + $0x328] ss:$28 sps:$4 sm:$0xff]  }
 0x244   :  { %2370 = vmatpush1.bf16.msra.mxu1 %v3281_v33  ;;  %v3364_v33 = vld [vmem:[#allocation10 + $0x6a8] ss:$28 sps:$4 sm:$0xff]  }
 0x245   :  { %2411 = vmatpush1.bf16.msra.mxu0 %v3284_v34  ;;  %2371 = vmatprep.subr.bf16.mxu1 %v3289_v35  ;;  %v3365_v34 = vld [vmem:[#allocation10 + $0x168] ss:$28 sps:$4 sm:$0xff]  }
 0x246   :  { %2412 = vmatprep.subr.bf16.mxu0 %v3292_v36  ;;  %v3366_v35 = vld [vmem:[#allocation10 + $0x4e8] ss:$28 sps:$4 sm:$0xff]   ;;  %v3367_v36 = vld [vmem:[#allocation10 + $0x2f0] ss:$28 sps:$4 sm:$0xff]  }
 0x248   :  { %2372 = vmatpush1.bf16.msra.mxu1 %v3287_v37  ;;  %v3368_v37 = vld [vmem:[#allocation10 + $0x670] ss:$28 sps:$4 sm:$0xff]  }
 0x249   :  { %2413 = vmatpush1.bf16.msra.mxu0 %v3290_v38  ;;  %2373 = vmatprep.subr.bf16.mxu1 %v3295_v39  ;;  %v3369_v38 = vld [vmem:[#allocation10 + $0x130] ss:$28 sps:$4 sm:$0xff]  }
 0x24a   :  { %2414 = vmatprep.subr.bf16.mxu0 %v3298_v40  ;;  %v3370_v39 = vld [vmem:[#allocation10 + $0x4b0] ss:$28 sps:$4 sm:$0xff]   ;;  %v3371_v40 = vld [vmem:[#allocation10 + $0x2b8] ss:$28 sps:$4 sm:$0xff]  }
 0x24c   :  { %2374 = vmatpush1.bf16.msra.mxu1 %v3293_v41  ;;  %v3372_v41 = vld [vmem:[#allocation10 + $0x638] ss:$28 sps:$4 sm:$0xff]  }
 0x24d   :  { %2415 = vmatpush1.bf16.msra.mxu0 %v3296_v43  ;;  %2375 = vmatprep.subr.bf16.mxu1 %v3301_v45  ;;  %v3373_v43 = vld [vmem:[#allocation10 + $0xf8] ss:$28 sps:$4 sm:$0xff]   ;;  %v3375_v45 = vld [vmem:[#allocation10 + $0x280] ss:$28 sps:$4 sm:$0xff]  }
 0x24e   :  { %2416 = vmatprep.subr.bf16.mxu0 %v3304_v46  ;;  %v3376_v46 = vld [vmem:[#allocation10 + $0x600] ss:$28 sps:$4 sm:$0xff]  }
 0x250   :  { %2376 = vmatpush1.bf16.msra.mxu1 %v3299_v47  ;;  %v3378_v47 = vld [vmem:[#allocation10 + $0x440] ss:$28 sps:$4 sm:$0xff]  }
 0x251   :  { %2417 = vmatpush1.bf16.msra.mxu0 %v3302_v48  ;;  %2377 = vmatprep.subr.bf16.mxu1 %v3307_v49  ;;  %v3379_v48 = vld [vmem:[#allocation10 + $0x248] ss:$28 sps:$4 sm:$0xff]  }
 0x252   :  { %2418 = vmatprep.subr.bf16.mxu0 %v3310_v50  ;;  %v3380_v49 = vld [vmem:[#allocation10 + $0x5c8] ss:$28 sps:$4 sm:$0xff]  }
 0x253   :  { %v3381_v50 = vld [vmem:[#allocation10 + $0x88] ss:$28 sps:$4 sm:$0xff]  }
 0x254   :  { %2378 = vmatpush1.bf16.msra.mxu1 %v3305_v51  ;;  %v3382_v51 = vld [vmem:[#allocation10 + $0x408] ss:$28 sps:$4 sm:$0xff]  }
 0x255   :  { %2419 = vmatpush1.bf16.msra.mxu0 %v3308_v52  ;;  %2379 = vmatprep.subr.bf16.mxu1 %v3313_v53  ;;  %v3383_v52 = vld [vmem:[#allocation10 + $0x210] ss:$28 sps:$4 sm:$0xff]  }
 0x256   :  { %2420 = vmatprep.subr.bf16.mxu0 %v3316_v54  ;;  %v3384_v53 = vld [vmem:[#allocation10 + $0x590] ss:$28 sps:$4 sm:$0xff]  }
 0x257   :  { %v3385_v54 = vld [vmem:[#allocation10 + $0x50] ss:$28 sps:$4 sm:$0xff]  }
 0x258   :  { %2380 = vmatpush2.bf16.msra.mxu1 %v3311_v55  ;;  %v3386_v55 = vld [vmem:[#allocation10 + $0x3d0] ss:$28 sps:$4 sm:$0xff]  }
 0x259   :  { %2421 = vmatpush2.bf16.msra.mxu0 %v3314_v56  ;;  %2381 = vmatprep.subr.bf16.mxu1 %v3319_v57  ;;  %v3387_v56 = vld [vmem:[#allocation10 + $0x1d8] ss:$28 sps:$4 sm:$0xff]  }
 0x25a   :  { %2422 = vmatprep.subr.bf16.mxu0 %v3322_v58  ;;  %v3388_v57 = vld [vmem:[#allocation10 + $0x558] ss:$28 sps:$4 sm:$0xff]  }
 0x25b   :  { %v3389_v58 = vld [vmem:[#allocation10 + $0x18] ss:$28 sps:$4 sm:$0xff]  }
 0x25c   :  { %2382 = vmatpush2.bf16.msra.mxu1 %v3317_v59  ;;  %v3390_v59 = vld [vmem:[#allocation10 + $0x398] ss:$28 sps:$4 sm:$0xff]  }
 0x25d   :  { %2423 = vmatpush2.bf16.msra.mxu0 %v3320_v60  ;;  %2383 = vmatprep.subr.bf16.mxu1 %v3325_v61  ;;  %v3649_v60 = vld [vmem:[%s3676_s6] sm:$0xff]  ;;  %s3545_s6 = smov [#allocation11]  }
 0x25e   :  { %2424 = vmatprep.subr.bf16.mxu0 %v3328_v62  ;;  %v1015_v61 = vrot.slane %v3649_v60, %v3604_v22  ;;  %v1019_v62 = vrot.slane %v3649_v60, %v3610_v24  ;;  %v1023_v24 = vrot.slane %v3649_v60, %v326_v42  ;;  %s2571_s30 = sshll.u32 %s3545_s6, 4  ;;  %s2572_s30 = int_to_ptr.vmem [resolvable:$true] %s2571_s30 }
 0x25f   :  { %s3505_s8 = scalar_lea.vmem %s2572_s30, 448  ;;  %p3510_p12 = scmp.lt.s32.totalorder %s2572_s30, %s2572_s30 }
 0x260   :  { %2384 = vmatpush2.bf16.msra.mxu1 %v3323_v63  ;;  %p3506_p11 = scmp.ne.s32.totalorder %s2572_s30, %s3505_s8  ;;  %p3511_p13 = scmp.lt.s32.totalorder %s3505_s8, %s3505_s8 }
 0x261   :  { %2425 = vmatpush2.bf16.msra.mxu0 %v3326_v0  ;;  %2385 = vmatprep.subr.bf16.mxu1 %v3331_v1 }
 0x262   :  { %2426 = vmatprep.subr.bf16.mxu0 %v3334_v2  ;;  %p3512_p0 = por %p3511_p13, %p3510_p12 }
 0x264   :  { %2386 = vmatpush2.bf16.msra.mxu1 %v3329_v3  ;;  %p3513_p1 = pnand %p3512_p0, %p3506_p11 }
 0x265   :  { %2427 = vmatpush2.bf16.msra.mxu0 %v3332_v5  ;;  %2387 = vmatprep.subr.bf16.mxu1 %v3337_v6 }
 0x266   :  { %2428 = vmatprep.subr.bf16.mxu0 %v3340_v9 }
 0x268   :  { %2388 = vmatpush2.bf16.msra.mxu1 %v3335_v11 }
 0x269   :  { %2429 = vmatpush2.bf16.msra.mxu0 %v3338_v12  ;;  %2389 = vmatprep.subr.bf16.mxu1 %v3343_v13 }
 0x26a   :  { %2430 = vmatprep.subr.bf16.mxu0 %v3346_v14 }
 0x26c   :  { %2390 = vmatpush2.bf16.msra.mxu1 %v3341_v15  ;;  %v1027_v15 = vrot.slane %v3649_v60, %v330_v44  ;;  %v1030_v44 = vsub.s32 4, %v3601_v21 }
 0x26d   :  { %2431 = vmatpush2.bf16.msra.mxu0 %v3344_v16  ;;  %2391 = vmatprep.subr.bf16.mxu1 %v3349_v17 }
 0x26e   :  { %2432 = vmatprep.subr.bf16.mxu0 %v3352_v18 }
 0x270   :  { %2392 = vmatpush2.bf16.msra.mxu1 %v3347_v19 }
 0x271   :  { %2433 = vmatpush2.bf16.msra.mxu0 %v3350_v20  ;;  %2393 = vmatprep.subr.bf16.mxu1 %v3355_v23 }
 0x272   :  { %2434 = vmatprep.subr.bf16.mxu0 %v3358_v25 }
 0x274   :  { %2394 = vmatpush2.bf16.msra.mxu1 %v3353_v26 }
 0x275   :  { %2435 = vmatpush2.bf16.msra.mxu0 %v3356_v27  ;;  %2894 = vmatprep.subr.bf16.mxu1 %v3359_v28 }
 0x276   :  { %2916 = vmatprep.subr.bf16.mxu0 %v3360_v29 }
 0x277   :  { %2396 = vmatmul.mubr.bf16.vlgmr.msra.gmra.mxu1 %v3624_v7 }
 0x278   :  { %2437 = vmatmul.mubr.bf16.vlgmr.msra.gmra.mxu0 %v3628_v10  ;;  %2895 = vmatpush3.bf16.msra.mxu1 %v3361_v30 }
 0x279   :  { %2477 = vmatprep.mubr.bf16.mxu1 %v3622_v4  ;;  %2917 = vmatpush3.bf16.msra.mxu0 %v3362_v31  ;;  %v3374_v4 = vld [vmem:[#allocation10 + $0x478] ss:$28 sps:$4 sm:$0xff]  }
 0x27a   :  { %2517 = vmatprep.mubr.bf16.mxu0 %v3626_v8  ;;  %2896 = vmatprep.subr.bf16.mxu1 %v3363_v32  ;;  %v3377_v8 = vld [vmem:[#allocation10 + $0xc0] ss:$28 sps:$4 sm:$0xff]  }
 0x27b   :  { %2918 = vmatprep.subr.bf16.mxu0 %v3364_v33  ;;  %v1034_v33 = vsub.s32 5, %v3601_v21 }
 0x27c   :  { %2897 = vmatpush3.bf16.msra.mxu1 %v3365_v34  ;;  %v1031_v34 = vrot.slane %v3649_v60, %v1030_v44 }
 0x27d   :  { %2919 = vmatpush3.bf16.msra.mxu0 %v3366_v35  ;;  %2898 = vmatprep.subr.bf16.mxu1 %v3367_v36  ;;  %v1035_v35 = vrot.slane %v3649_v60, %v1034_v33 }
 0x27e   :  { %2920 = vmatprep.subr.bf16.mxu0 %v3368_v37 }
 0x280   :  { %2899 = vmatpush3.bf16.msra.mxu1 %v3369_v38 }
 0x281   :  { %2921 = vmatpush3.bf16.msra.mxu0 %v3370_v39  ;;  %2900 = vmatprep.subr.bf16.mxu1 %v3371_v40 }
 0x282   :  { %2922 = vmatprep.subr.bf16.mxu0 %v3372_v41 }
 0x284   :  { %2901 = vmatpush3.bf16.msra.mxu1 %v3373_v43 }
 0x285   :  { %2923 = vmatpush3.bf16.msra.mxu0 %v3374_v4  ;;  %2902 = vmatprep.subr.bf16.mxu1 %v3375_v45 }
 0x286   :  { %2924 = vmatprep.subr.bf16.mxu0 %v3376_v46 }
 0x288   :  { %2903 = vmatpush3.bf16.msra.mxu1 %v3377_v8 }
 0x289   :  { %2925 = vmatpush3.bf16.msra.mxu0 %v3378_v47  ;;  %2904 = vmatprep.subr.bf16.mxu1 %v3379_v48 }
 0x28a   :  { %2926 = vmatprep.subr.bf16.mxu0 %v3380_v49 }
 0x28c   :  { %2905 = vmatpush3.bf16.msra.mxu1 %v3381_v50 }
 0x28d   :  { %2927 = vmatpush3.bf16.msra.mxu0 %v3382_v51  ;;  %2906 = vmatprep.subr.bf16.mxu1 %v3383_v52  ;;  %v1038_v51 = vsub.s32 6, %v3601_v21 }
 0x28e   :  { %2928 = vmatprep.subr.bf16.mxu0 %v3384_v53 }
 0x290   :  { %2907 = vmatpush3.bf16.msra.mxu1 %v3385_v54  ;;  %v1039_v54 = vrot.slane %v3649_v60, %v1038_v51 }
 0x291   :  { %2929 = vmatpush3.bf16.msra.mxu0 %v3386_v55  ;;  %2908 = vmatprep.subr.bf16.mxu1 %v3387_v56 }
 0x292   :  { %2930 = vmatprep.subr.bf16.mxu0 %v3388_v57 }
 0x294   :  { %2909 = vmatpush3.bf16.msra.mxu1 %v3389_v58 }
 0x295   :  { %2931 = vmatpush3.bf16.msra.mxu0 %v3390_v59 }
 0x297   :  { %2478 = vmatmul.mubr.bf16.vlgmr.msra.gmra.mxu1 %v3624_v7 }
 0x298   :  { %2518 = vmatmul.mubr.bf16.vlgmr.msra.gmra.mxu0 %v3628_v10 }
 0x2b7   :  { %v2233_v63 = vpop.f32.mrf.mxu1 }
 0x2b8   :  { %v2234_v0 = vadd.f32 %v2233_v63, %v1015_v61  ;;  %v2274_v1 = vpop.f32.mrf.mxu0 }
 0x2b9   :  { %v2235_v2 = vpop.f32.mrf.mxu1 }
 0x2ba   :  { %v2275_v3 = vadd.f32 %v2274_v1, %v2234_v0  ;;  %v2236_v5 = vadd.f32 %v2235_v2, %v1019_v62  ;;  %v2276_v7 = vpop.f32.mrf.mxu0 }
 0x2bb   :  { %v2237_v6 = vpop.f32.mrf.mxu1 }
 0x2bc   :  { %v2277_v10 = vadd.f32 %v2276_v7, %v2236_v5  ;;  %v2278_v9 = vpop.f32.mrf.mxu0  ;;  %3391 = vtanh.f32 %v2275_v3 }
 0x2bd   :  { %v2238_v11 = vpop.f32.mrf.mxu1 }
 0x2be   :  { %3393 = vtanh.f32 %v2277_v10  ;;  %v2279_v12 = vpop.f32.mrf.mxu0 }
 0x2c9   :  { %v3392_v13 = vpop.eup %3391 }
 0x2cb   :  { %v3394_v14 = vpop.eup %3393 }
 0x2cc   :  { %v2890_v22 = vpack.c.bf16 %v3394_v14, %v3392_v13 }
 0x2ce   :  { %2561 = vst [vmem:[#allocation11] sm:$0xff] %v2890_v22 }
 0x2f7   :  { %v2315_v16 = vpop.f32.mrf.mxu1 }
 0x2f8   :  { %v2316_v17 = vadd.f32 %v2315_v16, %v1023_v24  ;;  %v2356_v18 = vpop.f32.mrf.mxu0 }
 0x2f9   :  { %v2317_v19 = vpop.f32.mrf.mxu1 }
 0x2fa   :  { %v2357_v20 = vadd.f32 %v2356_v18, %v2316_v17  ;;  %v2318_v23 = vadd.f32 %v2317_v19, %v1027_v15  ;;  %v2358_v25 = vpop.f32.mrf.mxu0 }
 0x2fb   :  { %v2319_v26 = vpop.f32.mrf.mxu1 }
 0x2fc   :  { %v2359_v27 = vadd.f32 %v2358_v25, %v2318_v23  ;;  %v2360_v28 = vpop.f32.mrf.mxu0  ;;  %3395 = vtanh.f32 %v2357_v20 }
 0x2fd   :  { %v2320_v29 = vpop.f32.mrf.mxu1 }
 0x2fe   :  { %3397 = vtanh.f32 %v2359_v27  ;;  %v2361_v30 = vpop.f32.mrf.mxu0 }
 0x309   :  { %v3396_v31 = vpop.eup %3395 }
 0x30b   :  { %v3398_v42 = vpop.eup %3397 }
 0x30c   :  { %v2891_v32 = vpack.c.bf16 %v3398_v42, %v3396_v31 }
 0x30e   :  { %2562 = vst [vmem:[#allocation11 + $0x8] sm:$0xff] %v2891_v32 }
 0x337   :  { %v2397_v36 = vpop.f32.mrf.mxu1 }
 0x338   :  { %v2398_v37 = vadd.f32 %v2397_v36, %v1031_v34  ;;  %v2438_v38 = vpop.f32.mrf.mxu0 }
 0x339   :  { %v2399_v39 = vpop.f32.mrf.mxu1 }
 0x33a   :  { %v2439_v40 = vadd.f32 %v2438_v38, %v2398_v37  ;;  %v2400_v41 = vadd.f32 %v2399_v39, %v1035_v35  ;;  %v2440_v43 = vpop.f32.mrf.mxu0 }
 0x33b   :  { %v2401_v4 = vpop.f32.mrf.mxu1 }
 0x33c   :  { %v2441_v45 = vadd.f32 %v2440_v43, %v2400_v41  ;;  %v2442_v46 = vpop.f32.mrf.mxu0  ;;  %3399 = vtanh.f32 %v2439_v40 }
 0x33d   :  { %v2402_v8 = vpop.f32.mrf.mxu1 }
 0x33e   :  { %3401 = vtanh.f32 %v2441_v45  ;;  %v2443_v47 = vpop.f32.mrf.mxu0 }
 0x349   :  { %v3400_v48 = vpop.eup %3399 }
 0x34b   :  { %v3402_v49 = vpop.eup %3401 }
 0x34c   :  { %v2892_v50 = vpack.c.bf16 %v3402_v49, %v3400_v48 }
 0x34e   :  { %2563 = vst [vmem:[#allocation11 + $0x10] sm:$0xff] %v2892_v50 }
 0x357   :  { %v2910_v52 = vpop.f32.mrf.mxu1 }
 0x358   :  { %v2932_v53 = vpop.f32.mrf.mxu0 }
 0x359   :  { %v2911_v55 = vpop.f32.mrf.mxu1 }
 0x35a   :  { %v2912_v56 = vadd.f32 %v2911_v55, %v2910_v52  ;;  %v2933_v57 = vpop.f32.mrf.mxu0 }
 0x35b   :  { %v2913_v58 = vpop.f32.mrf.mxu1  ;;  %v2934_v61 = vadd.f32 %v2933_v57, %v2932_v53 }
 0x35c   :  { %v2480_v59 = vadd.f32 %v2912_v56, %v1039_v54  ;;  %v2935_v62 = vpop.f32.mrf.mxu0 }
 0x35d   :  { %v2914_v63 = vpop.f32.mrf.mxu1 }
 0x35e   :  { %v2520_v0 = vadd.f32 %v2934_v61, %v2480_v59  ;;  %v2936_v1 = vpop.f32.mrf.mxu0 }
 0x360   :  { %3403 = vtanh.f32 %v2520_v0 }
 0x36d   :  { %v3404_v2 = vpop.eup %3403 }
 0x36e   :  { %v2893_v3 = vpack.c.bf16 %v3404_v2, %v3404_v2 }
 0x370   :  { %2564 = vst [vmem:[#allocation11 + $0x18] sm:$0xf] %v2893_v3 }
 0x371   :  { %3516 = shalt.err (!%p3513_p1)
}
 0x372   :  { %2574 = dma.vmem_to_hbm [thread:$0]  %s2572_s30, 448, %s3677_s7, [#allocation4]  }
 0x373   :  { %3531 = dma.done.wait [#allocation4], 448  }
 0x374   :  { %3532 = vsyncadd [#allocation4], 4294966848 }
 0x375   :  { %2578 = vsyncpa [#allocation3], 1 }
 0x376   :  { %2579 = vsyncpa [#allocation6], 1 }
 0x377   :  { %2580 = vsyncpa [#allocation9], 1 }
 0x378   :  { %2581 = vsyncpa [#allocation4], 1 }

</bundles_post_ra>
